<compile_context>
chip_gen: v6e
topology: v6e:2x2x1
jax: 0.10.0
libtpu: 0.0.40
codegen_flags: <defaults>
</compile_context>

<pallas_src>
import jax
import jax.numpy as jnp
from jax.experimental import pallas as pl
from jax.experimental.pallas import tpu as pltpu


def _round_up(n, m):
    return ((n + m - 1) // m) * m


def _cdiv(a, b):
    return -(-a // b)


def _choose_block_b(B):
    """>=2 grid steps (v7x megacore), ~512-row tiles for large B, 16-row grain."""
    n_blocks = max(2, _cdiv(B, 512))
    blk = _round_up(_cdiv(B, n_blocks), 16)
    return max(8, min(blk, _round_up(B, 8)))


def _actor_kernel(x_ref, u_ref, w1_ref, b1_ref, w2_ref, b2_ref, w3_ref,
                  b3_ref, policy_ref, *logits_ref):
    """One batch block: 3-layer MLP -> Gumbel-perturbed softmax policy."""
    f32 = jnp.float32

    def lrelu(v):
        return jnp.where(v > 0, v, 0.01 * v)

    h1 = lrelu(jnp.dot(x_ref[...], w1_ref[...],
                       preferred_element_type=f32) + b1_ref[...])
    h2 = lrelu(jnp.dot(h1, w2_ref[...],
                       preferred_element_type=f32) + b2_ref[...])
    logits = jnp.dot(h2, w3_ref[...],
                     preferred_element_type=f32) + b3_ref[...]

    if logits_ref:                       # model_original_out=True path
        logits_ref[0][...] = logits

    # u ~ Uniform[0,1) streamed from the wrapper (torch.rand_like equivalent);
    # clip keeps log(-log(u)) finite.
    u = jnp.clip(u_ref[...], 1e-7, 1.0 - 1e-7)

    # Gumbel perturbation + numerically stable softmax along the action dim.
    z = logits - jnp.log(-jnp.log(u))
    z = z - jnp.max(z, axis=-1, keepdims=True)
    e = jnp.exp(z)
    policy_ref[...] = e / jnp.sum(e, axis=-1, keepdims=True)


def openai_actor_forward(x, params, key, *, block_b=None,
                         model_original_out=False):
    """x: (B, num_inputs) f32; params from init_params; key: jax PRNG key."""
    B, num_inputs = x.shape
    H = params["w1"].shape[1]
    A = params["w3"].shape[1]

    if block_b is None:
        block_b = _choose_block_b(B)
    block_b = max(8, min(block_b, _round_up(B, 8)))
    grid = (_cdiv(B, block_b),)

    # torch.rand_like(model_out) equivalent, generated once on-device.
    u = jax.random.uniform(key, (B, A), jnp.float32)

    batched = lambda i: (i, 0)    # x / u / outputs stream over the batch
    resident = lambda i: (0, 0)   # weights / biases stay in VMEM

    out_shape = [jax.ShapeDtypeStruct((B, A), jnp.float32)]
    out_specs = [pl.BlockSpec((block_b, A), batched)]
    if model_original_out:
        out_shape.append(jax.ShapeDtypeStruct((B, A), jnp.float32))
        out_specs.append(pl.BlockSpec((block_b, A), batched))

    results = pl.pallas_call(
        _actor_kernel,
        out_shape=out_shape,
        grid=grid,
        in_specs=[
            pl.BlockSpec((block_b, num_inputs), batched),   # x
            pl.BlockSpec((block_b, A), batched),            # u (uniform noise)
            pl.BlockSpec((num_inputs, H), resident),        # w1
            pl.BlockSpec((1, H), resident),                 # b1
            pl.BlockSpec((H, H), resident),                 # w2
            pl.BlockSpec((1, H), resident),                 # b2
            pl.BlockSpec((H, A), resident),                 # w3
            pl.BlockSpec((1, A), resident),                 # b3
        ],
        out_specs=out_specs,
        compiler_params=pltpu.CompilerParams(
            dimension_semantics=("parallel",),   # v7x: batch over both TCs
        ),
    )(x, u, params["w1"], params["b1"], params["w2"], params["b2"],
      params["w3"], params["b3"])

    policy = results[0]
    if model_original_out:
        return results[1], policy
    return policy


def init_params(key, num_inputs, num_units, action_size):
    """Mirror the PyTorch module: xavier_uniform(gain=leaky_relu) weights,
    default nn.Linear uniform biases. Weights stored as (in, out) = W^T."""
    gain = (2.0 / (1.0 + 0.01 ** 2)) ** 0.5  # calculate_gain('leaky_relu')

    def xavier(k, fan_in, fan_out):
        a = gain * (6.0 / (fan_in + fan_out)) ** 0.5
        return jax.random.uniform(k, (fan_in, fan_out), jnp.float32, -a, a)

    def bias(k, fan_in, fan_out):
        bnd = 1.0 / (fan_in ** 0.5)
        return jax.random.uniform(k, (1, fan_out), jnp.float32, -bnd, bnd)

    ks = jax.random.split(key, 6)
    return {
        "w1": xavier(ks[0], num_inputs, num_units),
        "b1": bias(ks[1], num_inputs, num_units),
        "w2": xavier(ks[2], num_units, num_units),
        "b2": bias(ks[3], num_units, num_units),
        "w3": xavier(ks[4], num_units, action_size),
        "b3": bias(ks[5], num_units, action_size),
    }


def reference_logits(x, params):
    """Pure-JAX f32 reference for the deterministic MLP ("model_out")."""
    lrelu = lambda v: jnp.where(v > 0, v, 0.01 * v)
    h1 = lrelu(x @ params["w1"] + params["b1"])
    h2 = lrelu(h1 @ params["w2"] + params["b2"])
    return h2 @ params["w3"] + params["b3"]


if __name__ == "__main__":
    key = jax.random.PRNGKey(0)
    # Non-multiple batch exercises the masked edge block; feature dims match
    # the module (num_inputs=32, num_units_openai=64, action_size=16).
    B, NUM_INPUTS, NUM_UNITS, ACTION_SIZE = 300, 32, 64, 16

    k_x, k_p, k_u = jax.random.split(key, 3)
    params = init_params(k_p, NUM_INPUTS, NUM_UNITS, ACTION_SIZE)
    x = jax.random.normal(k_x, (B, NUM_INPUTS), jnp.float32)

    # model_original_out=True path: returns (model_out, policy) like the module.
    model_out, policy = openai_actor_forward(x, params, k_u,
                                             model_original_out=True)
    policy = jax.block_until_ready(policy)

    # Default forward (policy only) and a determinism check with the same key.
    policy_only = jax.block_until_ready(openai_actor_forward(x, params, k_u))
    _, policy2 = openai_actor_forward(x, params, k_u, model_original_out=True)
    policy2 = jax.block_until_ready(policy2)

    ref = reference_logits(x, params)

    assert policy.shape == (B, ACTION_SIZE)
    assert model_out.shape == (B, ACTION_SIZE)
    assert bool(jnp.all(jnp.isfinite(policy)))
    assert bool(jnp.all(policy >= 0.0)) and bool(jnp.all(policy <= 1.0))
    # Deterministic MLP part vs. pure-JAX f32 reference (MXU precision slack).
    assert jnp.allclose(model_out, ref, atol=2e-2, rtol=2e-2)
    # softmax(logits + Gumbel noise) is a valid distribution per row.
    assert jnp.allclose(jnp.sum(policy, axis=-1), 1.0, atol=1e-4)
    assert jnp.allclose(jnp.sum(policy_only, axis=-1), 1.0, atol=1e-4)
    # Same key -> identical sampled policy (and across both output variants).
    assert bool(jnp.array_equal(policy, policy2))
    assert jnp.allclose(policy, policy_only, atol=1e-6)

    print("KERNEL_OK")
</pallas_src>

<mosaic_0001>
module attributes {stable_mosaic.version = 11 : i64} {
  func.func @_actor_kernel(%arg0: i32, %arg1: memref<160x32xf32, #tpu.memory_space<vmem>>, %arg2: memref<160x16xf32, #tpu.memory_space<vmem>>, %arg3: memref<32x64xf32, #tpu.memory_space<vmem>>, %arg4: memref<1x64xf32, #tpu.memory_space<vmem>>, %arg5: memref<64x64xf32, #tpu.memory_space<vmem>>, %arg6: memref<1x64xf32, #tpu.memory_space<vmem>>, %arg7: memref<64x16xf32, #tpu.memory_space<vmem>>, %arg8: memref<1x16xf32, #tpu.memory_space<vmem>>, %arg9: memref<160x16xf32, #tpu.memory_space<vmem>>, %arg10: memref<160x16xf32, #tpu.memory_space<vmem>>) attributes {dimension_semantics = [#tpu.dimension_semantics<parallel>], iteration_bounds = array<i64: 2>, scalar_prefetch = 0 : i64, scratch_operands = 0 : i64, tpu.core_type = #tpu.core_type<tc>, window_params = [{transform_indices = @transform_0, window_bounds = array<i64: 160, 32>}, {transform_indices = @transform_1, window_bounds = array<i64: 160, 16>}, {pipeline_mode = #tpu.pipeline_mode<synchronous>, transform_indices = @transform_2, window_bounds = array<i64: 32, 64>}, {pipeline_mode = #tpu.pipeline_mode<synchronous>, transform_indices = @transform_3, window_bounds = array<i64: 1, 64>}, {pipeline_mode = #tpu.pipeline_mode<synchronous>, transform_indices = @transform_4, window_bounds = array<i64: 64, 64>}, {pipeline_mode = #tpu.pipeline_mode<synchronous>, transform_indices = @transform_5, window_bounds = array<i64: 1, 64>}, {pipeline_mode = #tpu.pipeline_mode<synchronous>, transform_indices = @transform_6, window_bounds = array<i64: 64, 16>}, {pipeline_mode = #tpu.pipeline_mode<synchronous>, transform_indices = @transform_7, window_bounds = array<i64: 1, 16>}, {transform_indices = @transform_8, window_bounds = array<i64: 160, 16>}, {transform_indices = @transform_9, window_bounds = array<i64: 160, 16>}]} {
    %c0 = arith.constant 0 : index
    %c0_0 = arith.constant 0 : index
    %0 = vector.load %arg1[%c0, %c0_0] : memref<160x32xf32, #tpu.memory_space<vmem>>, vector<160x32xf32>
    %c0_1 = arith.constant 0 : index
    %c0_2 = arith.constant 0 : index
    %1 = vector.load %arg3[%c0_1, %c0_2] : memref<32x64xf32, #tpu.memory_space<vmem>>, vector<32x64xf32>
    %cst = arith.constant dense<0.000000e+00> : vector<160x64xf32>
    %2 = tpu.matmul %0, %1, %cst {dimension_numbers = #tpu.dot_dimension_numbers<[1], [0], [0], [1], [0, 0, 1, 1], [], []>} : vector<160x32xf32>, vector<32x64xf32>, vector<160x64xf32> -> vector<160x64xf32>
    %c0_3 = arith.constant 0 : index
    %c0_4 = arith.constant 0 : index
    %3 = vector.load %arg4[%c0_3, %c0_4] : memref<1x64xf32, #tpu.memory_space<vmem>>, vector<1x64xf32>
    %4 = vector.broadcast %3 : vector<1x64xf32> to vector<160x64xf32>
    %5 = arith.addf %2, %4 : vector<160x64xf32>
    %cst_5 = arith.constant 0.000000e+00 : f32
    %6 = vector.broadcast %cst_5 : f32 to vector<160x64xf32>
    %7 = arith.cmpf ogt, %5, %6 : vector<160x64xf32>
    %cst_6 = arith.constant 0.00999999977 : f32
    %8 = vector.broadcast %cst_6 : f32 to vector<160x64xf32>
    %9 = arith.mulf %8, %5 : vector<160x64xf32>
    %10 = arith.select %7, %5, %9 : vector<160x64xi1>, vector<160x64xf32>
    %c0_7 = arith.constant 0 : index
    %c0_8 = arith.constant 0 : index
    %11 = vector.load %arg5[%c0_7, %c0_8] : memref<64x64xf32, #tpu.memory_space<vmem>>, vector<64x64xf32>
    %cst_9 = arith.constant dense<0.000000e+00> : vector<160x64xf32>
    %12 = tpu.matmul %10, %11, %cst_9 {dimension_numbers = #tpu.dot_dimension_numbers<[1], [0], [0], [1], [0, 0, 1, 1], [], []>} : vector<160x64xf32>, vector<64x64xf32>, vector<160x64xf32> -> vector<160x64xf32>
    %c0_10 = arith.constant 0 : index
    %c0_11 = arith.constant 0 : index
    %13 = vector.load %arg6[%c0_10, %c0_11] : memref<1x64xf32, #tpu.memory_space<vmem>>, vector<1x64xf32>
    %14 = vector.broadcast %13 : vector<1x64xf32> to vector<160x64xf32>
    %15 = arith.addf %12, %14 : vector<160x64xf32>
    %cst_12 = arith.constant 0.000000e+00 : f32
    %16 = vector.broadcast %cst_12 : f32 to vector<160x64xf32>
    %17 = arith.cmpf ogt, %15, %16 : vector<160x64xf32>
    %cst_13 = arith.constant 0.00999999977 : f32
    %18 = vector.broadcast %cst_13 : f32 to vector<160x64xf32>
    %19 = arith.mulf %18, %15 : vector<160x64xf32>
    %20 = arith.select %17, %15, %19 : vector<160x64xi1>, vector<160x64xf32>
    %c0_14 = arith.constant 0 : index
    %c0_15 = arith.constant 0 : index
    %21 = vector.load %arg7[%c0_14, %c0_15] : memref<64x16xf32, #tpu.memory_space<vmem>>, vector<64x16xf32>
    %cst_16 = arith.constant dense<0.000000e+00> : vector<160x16xf32>
    %22 = tpu.matmul %20, %21, %cst_16 {dimension_numbers = #tpu.dot_dimension_numbers<[1], [0], [0], [1], [0, 0, 1, 1], [], []>} : vector<160x64xf32>, vector<64x16xf32>, vector<160x16xf32> -> vector<160x16xf32>
    %c0_17 = arith.constant 0 : index
    %c0_18 = arith.constant 0 : index
    %23 = vector.load %arg8[%c0_17, %c0_18] : memref<1x16xf32, #tpu.memory_space<vmem>>, vector<1x16xf32>
    %24 = vector.broadcast %23 : vector<1x16xf32> to vector<160x16xf32>
    %25 = arith.addf %22, %24 : vector<160x16xf32>
    %c0_19 = arith.constant 0 : index
    %c0_20 = arith.constant 0 : index
    %26 = vector.load %arg10[%c0_19, %c0_20] : memref<160x16xf32, #tpu.memory_space<vmem>>, vector<160x16xf32>
    tpu.vector_store %arg10[%c0_19, %c0_20], %25 {strides = array<i32>} : memref<160x16xf32, #tpu.memory_space<vmem>>, vector<160x16xf32>,
    %c0_21 = arith.constant 0 : index
    %c0_22 = arith.constant 0 : index
    %27 = vector.load %arg2[%c0_21, %c0_22] : memref<160x16xf32, #tpu.memory_space<vmem>>, vector<160x16xf32>
    %cst_23 = arith.constant 1.000000e-07 : f32
    %cst_24 = arith.constant 0.99999988 : f32
    %28 = vector.broadcast %cst_23 : f32 to vector<160x16xf32>
    %29 = arith.maximumf %28, %27 : vector<160x16xf32>
    %30 = vector.broadcast %cst_24 : f32 to vector<160x16xf32>
    %31 = arith.minimumf %30, %29 : vector<160x16xf32>
    %32 = math.log %31 : vector<160x16xf32>
    %cst_25 = arith.constant 0.000000e+00 : f32
    %33 = vector.broadcast %cst_25 : f32 to vector<160x16xf32>
    %34 = arith.subf %33, %32 : vector<160x16xf32>
    %35 = math.log %34 : vector<160x16xf32>
    %36 = arith.subf %25, %35 : vector<160x16xf32>
    %cst_26 = arith.constant dense<0xFF800000> : vector<160xf32>
    %37 = vector.multi_reduction <maximumf>, %36, %cst_26 [1] : vector<160x16xf32> to vector<160xf32>
    %38 = vector.shape_cast %37 : vector<160xf32> to vector<160x1xf32>
    %39 = vector.broadcast %38 : vector<160x1xf32> to vector<160x16xf32>
    %40 = arith.subf %36, %39 : vector<160x16xf32>
    %41 = math.exp %40 : vector<160x16xf32>
    %cst_27 = arith.constant dense<0.000000e+00> : vector<160xf32>
    %42 = vector.multi_reduction <add>, %41, %cst_27 [1] : vector<160x16xf32> to vector<160xf32>
    %43 = vector.shape_cast %42 : vector<160xf32> to vector<160x1xf32>
    %44 = vector.broadcast %43 : vector<160x1xf32> to vector<160x16xf32>
    %45 = arith.divf %41, %44 : vector<160x16xf32>
    %c0_28 = arith.constant 0 : index
    %c0_29 = arith.constant 0 : index
    %46 = vector.load %arg9[%c0_28, %c0_29] : memref<160x16xf32, #tpu.memory_space<vmem>>, vector<160x16xf32>
    tpu.vector_store %arg9[%c0_28, %c0_29], %45 {strides = array<i32>} : memref<160x16xf32, #tpu.memory_space<vmem>>, vector<160x16xf32>,
    return
  }
  func.func @transform_0(%arg0: i32) -> (i32, i32) {
    %c0_i32 = arith.constant 0 : i32
    %c0_i32_0 = arith.constant 0 : i32
    return %arg0, %c0_i32 : i32, i32
  }
  func.func @transform_1(%arg0: i32) -> (i32, i32) {
    %c0_i32 = arith.constant 0 : i32
    %c0_i32_0 = arith.constant 0 : i32
    return %arg0, %c0_i32 : i32, i32
  }
  func.func @transform_2(%arg0: i32) -> (i32, i32) {
    %c0_i32 = arith.constant 0 : i32
    %c0_i32_0 = arith.constant 0 : i32
    %c0_i32_1 = arith.constant 0 : i32
    return %c0_i32, %c0_i32_0 : i32, i32
  }
  func.func @transform_3(%arg0: i32) -> (i32, i32) {
    %c0_i32 = arith.constant 0 : i32
    %c0_i32_0 = arith.constant 0 : i32
    %c0_i32_1 = arith.constant 0 : i32
    return %c0_i32, %c0_i32_0 : i32, i32
  }
  func.func @transform_4(%arg0: i32) -> (i32, i32) {
    %c0_i32 = arith.constant 0 : i32
    %c0_i32_0 = arith.constant 0 : i32
    %c0_i32_1 = arith.constant 0 : i32
    return %c0_i32, %c0_i32_0 : i32, i32
  }
  func.func @transform_5(%arg0: i32) -> (i32, i32) {
    %c0_i32 = arith.constant 0 : i32
    %c0_i32_0 = arith.constant 0 : i32
    %c0_i32_1 = arith.constant 0 : i32
    return %c0_i32, %c0_i32_0 : i32, i32
  }
  func.func @transform_6(%arg0: i32) -> (i32, i32) {
    %c0_i32 = arith.constant 0 : i32
    %c0_i32_0 = arith.constant 0 : i32
    %c0_i32_1 = arith.constant 0 : i32
    return %c0_i32, %c0_i32_0 : i32, i32
  }
  func.func @transform_7(%arg0: i32) -> (i32, i32) {
    %c0_i32 = arith.constant 0 : i32
    %c0_i32_0 = arith.constant 0 : i32
    %c0_i32_1 = arith.constant 0 : i32
    return %c0_i32, %c0_i32_0 : i32, i32
  }
  func.func @transform_8(%arg0: i32) -> (i32, i32) {
    %c0_i32 = arith.constant 0 : i32
    %c0_i32_0 = arith.constant 0 : i32
    return %arg0, %c0_i32 : i32, i32
  }
  func.func @transform_9(%arg0: i32) -> (i32, i32) {
    %c0_i32 = arith.constant 0 : i32
    %c0_i32_0 = arith.constant 0 : i32
    return %arg0, %c0_i32 : i32, i32
  }
}

</mosaic_0001>

<bundles_post_ra>
// kernel: tpu_custom_call.1
= control target key start
LH: loop header
LB: loop body
LE: loop exit
PB: predicated region body
PF: predicated region fallthrough
CT: control target
= control target key end

     0   :  { %s3891_s0 = inlined_call_operand.vmem [shape: f32[300,32], index: 0, kind: input, shape index: {}]   ;;  %s3892_s1 = inlined_call_operand.vmem [shape: f32[300,16], index: 1, kind: input, shape index: {}]   ;;  %s3893_s2 = inlined_call_operand.vmem [shape: f32[32,64], index: 2, kind: input, shape index: {}]   ;;  %s3894_s3 = inlined_call_operand.vmem [shape: f32[1,64], index: 3, kind: input, shape index: {}]   ;;  %s3895_s4 = inlined_call_operand.vmem [shape: f32[64,64], index: 4, kind: input, shape index: {}]   ;;  %s3896_s5 = inlined_call_operand.vmem [shape: f32[1,64], index: 5, kind: input, shape index: {}]   ;;  %s3897_s6 = inlined_call_operand.vmem [shape: f32[64,16], index: 6, kind: input, shape index: {}]   ;;  %s3898_s7 = inlined_call_operand.vmem [shape: f32[1,16], index: 7, kind: input, shape index: {}]   ;;  %s3899_s8 = inlined_call_operand.vmem [shape: f32[300,16], index: 8, kind: output, shape index: {0}]   ;;  %s3900_s9 = inlined_call_operand.vmem [shape: f32[300,16], index: 9, kind: output, shape index: {1}]  }
   0x1   :  { %3901 = sst [smem:[#allocation4_spill]] %s3891_s0 }
   0x2   :  { %3902 = sst [smem:[#allocation5_spill]] %s3892_s1 }
   0x3   :  { %3903 = sst [smem:[#allocation6_spill]] %s3893_s2 }
   0x4   :  { %s3120_s30 = smov 0   ;;  %s3122_s10 = smov 0  }
   0x5   :  { %s3124_s11 = smov 0  }
   0x6 LB: > { %s3133_s12 = sadd.s32 4294967295, %s3004_s11   ;;  %s3135_s13 = sadd.s32 1, %s3004_s11   ;;  %s3004_s11 = sphi %s3124_s11, %s3916_s11   ;;  %s3000_s10 = sphi %s3122_s10, %s3915_s10   ;;  %s2996_s30 = sphi %s3120_s30, %s3914_s30  }
   0x7   : > { %s202_s14 = ssub.s32 %s3004_s11, %s3135_s13  ;;  %s205_s15 = sadd.s32 1, %s3000_s10 }
   0x8   : > { %p203_p0 = scmp.eq.s32.totalorder %s202_s14, 0  ;;  %p215_p1 = scmp.ne.s32.totalorder %s3000_s10, %s2996_s30 }
   0x9   : > { %p216_p2 = scmp.eq.s32.totalorder %s3133_s12, 1  ;;  %p2287_p3 = scmp.ge.s32.totalorder %s3004_s11, 1 }
   0xa   : > { %s3143_s16 = scalar_select %p203_p0, %s3000_s10, %s205_s15  }
   0xb   : > { %p3145_p4 = por %p216_p2, %p215_p1  ;;  %p318_p5 = scmp.lt.s32.totalorder %s3004_s11, 3 }
   0xd   : > { %p319_p6 = pnand %p2287_p3, %p318_p5 }
   0xe   : > { %s3905_s2 = sld [smem:[#allocation6_spill]] (!%p319_p6)  ;;  %s3156_s22 = smul.u32 (!%p319_p6), 20, %s3133_s12 }
   0xf   : > { %322 = sbr.rel (%p319_p6) target bundleno = 1100 (0x44c), region = 52  ;;  %s3906_s0 = sld [smem:[#allocation4_spill]] (!%p319_p6) }
  0x10   : > { %p375_p7 = scmp.lt.s32.totalorder (!%p319_p6), %s3156_s22, 37  ;;  %s3907_s1 = sld [smem:[#allocation5_spill]] (!%p319_p6) }
  0x14   : > { %v431_v0 = vld [vmem:[%s3905_s2 + $0x18] sm:$0xff]  ;;  %v430_v1 = vld [vmem:[%s3905_s2 + $0x10] sm:$0xff]  ;;  %v429_v2 = vld [vmem:[%s3905_s2 + $0x8] sm:$0xff]  ;;  %s3166_s27 = scalar_select %p375_p7, %s3156_s22, 37  ;;  %vm439_vm0 = vcmask 261120   ;;  %vm740_vm1 = vcmask 523264  }
  0x15   : > { %2457 = vmatprep.subr.mxu0 %v431_v0  ;;  %2587 = vmatprep.subr.mxu1 %v431_v0  ;;  %v428_v3 = vld [vmem:[%s3905_s2] sm:$0xff]  ;;  %v732_v4 = vld [vmem:[%s3895_s4 + $0x38] sm:$0xff]  ;;  %v731_v13 = vld [vmem:[%s3895_s4 + $0x30] sm:$0xff]  ;;  %s1719_s24 = ssub.s32 (%p3145_p4), 38, %s3156_s22  ;;  %s2375_s25 = smul.u32 (%p3145_p4), 160, %s3133_s12 }
  0x16   : > { %2458 = vmatpush3.msra.mxu0 %v431_v0  ;;  %2591 = vmatpush3.msra.mxu1 %v431_v0  ;;  %s2288_s28 = sshll.u32 %s3166_s27, 3  ;;  %v730_v18 = vld [vmem:[%s3895_s4 + $0x28] sm:$0xff]  ;;  %v729_v23 = vld [vmem:[%s3895_s4 + $0x20] sm:$0xff]  ;;  %v728_v27 = vld [vmem:[%s3895_s4 + $0x18] sm:$0xff]  ;;  %s361_s27 = sand.u32 1, %s2996_s30  }
  0x17   : > { %2459 = vmatprep.subr.mxu0 %v430_v1  ;;  %2588 = vmatprep.subr.mxu1 %v430_v1  ;;  %s3177_s18 = scalar_lea.vmem %s3906_s0, %s2288_s28  ;;  %v727_v29 = vld [vmem:[%s3895_s4 + $0x10] sm:$0xff]  ;;  %v726_v30 = vld [vmem:[%s3895_s4 + $0x8] sm:$0xff]  ;;  %v725_v31 = vld [vmem:[%s3895_s4] sm:$0xff]  ;;  %s3359_s20 = scalar_lea.vmem %s3907_s1, %s2288_s28 }
  0x18   : > { %2460 = vmatpush3.msra.mxu0 %v430_v1  ;;  %2592 = vmatpush3.msra.mxu1 %v430_v1  ;;  %v408_v5 = vld [vmem:[%s3177_s18] sm:$0xff]  ;;  %v409_v6 = vld [vmem:[%s3177_s18 + $0x8] sm:$0xff]  ;;  %v410_v7 = vld [vmem:[%s3177_s18 + $0x10] sm:$0xff]  ;;  %s3382_s28 = smul.u32 160, %s361_s27  ;;  %p1720_p8 = scmp.lt.s32.totalorder (%p3145_p4), %s1719_s24, 20 }
  0x19   : > { %2461 = vmatprep.subr.mxu0 %v429_v2  ;;  %2589 = vmatprep.subr.mxu1 %v429_v2  ;;  %v411_v8 = vld [vmem:[%s3177_s18 + $0x18] sm:$0xff]  ;;  %v418_v9 = vld [vmem:[%s3177_s18 + $0x50] sm:$0xff]  ;;  %v412_v11 = vld [vmem:[%s3177_s18 + $0x20] sm:$0xff]  ;;  %s3702_s11 = scalar_lea.vmem (%p3145_p4), %s3899_s8, %s2375_s25  }
  0x1a   : > { %2462 = vmatpush3.msra.mxu0 %v429_v2  ;;  %2593 = vmatpush3.msra.mxu1 %v429_v2  ;;  %v419_v10 = vld [vmem:[%s3177_s18 + $0x58] sm:$0xff]  ;;  %v420_v12 = vld [vmem:[%s3177_s18 + $0x60] sm:$0xff]  ;;  %v421_v14 = vld [vmem:[%s3177_s18 + $0x68] sm:$0xff]  ;;  %s3391_s30 = scalar_lea.vmem [#allocation3], %s3382_s28   ;;  %s3634_s23 = scalar_lea.vmem [#allocation2], %s3382_s28  }
  0x1b   : > { %2463 = vmatprep.subr.mxu0 %v428_v3  ;;  %2590 = vmatprep.subr.mxu1 %v428_v3  ;;  %v413_v15 = vld [vmem:[%s3177_s18 + $0x28] sm:$0xff]  ;;  %v422_v16 = vld [vmem:[%s3177_s18 + $0x70] sm:$0xff]  ;;  %v423_v19 = vld [vmem:[%s3177_s18 + $0x78] sm:$0xff] }
  0x1c   : > { %2464 = vmatpush3.msra.mxu0 %v428_v3  ;;  %2594 = vmatpush3.msra.mxu1 %v428_v3  ;;  %v414_v17 = vld [vmem:[%s3177_s18 + $0x30] sm:$0xff]  ;;  %v415_v20 = vld [vmem:[%s3177_s18 + $0x38] sm:$0xff]  ;;  %v424_v21 = vld [vmem:[%s3177_s18 + $0x80] sm:$0xff] }
  0x1d   : > { %2465 = vmatprep.mubr.msk.f32.mxu0 %vm439_vm0, %v408_v5  ;;  %2495 = vmatprep.subr.mxu1 %v732_v4  ;;  %v416_v22 = vld [vmem:[%s3177_s18 + $0x40] sm:$0xff]  ;;  %v425_v24 = vld [vmem:[%s3177_s18 + $0x88] sm:$0xff]  ;;  %v426_v26 = vld [vmem:[%s3177_s18 + $0x90] sm:$0xff] }
  0x1e   : > { %2466 = vmatmul.mubr.msk.f32.vlgmr.msra.gmra.mxu0 %vm439_vm0, %v409_v6  ;;  %2480 = vmatprep.mubr.msk.f32.mxu1 %vm439_vm0, %v418_v9  ;;  %v417_v25 = vld [vmem:[%s3177_s18 + $0x48] sm:$0xff]  ;;  %v427_v28 = vld [vmem:[%s3177_s18 + $0x98] sm:$0xff]  ;;  %v1032_v33 = vld [vmem:[%s3897_s6 + $0x30] sm:$0xff] }
  0x1f   : > { %2468 = vmatprep.mubr.msk.f32.mxu0 %vm439_vm0, %v410_v7  ;;  %2481 = vmatmul.mubr.msk.f32.vlgmr.msra.gmra.mxu1 %vm439_vm0, %v419_v10  ;;  %v1033_v32 = vld [vmem:[%s3897_s6 + $0x38] sm:$0xff]  ;;  %v1031_v34 = vld [vmem:[%s3897_s6 + $0x28] sm:$0xff]  ;;  %v1030_v35 = vld [vmem:[%s3897_s6 + $0x20] sm:$0xff] }
  0x20   : > { %2483 = vmatprep.mubr.msk.f32.mxu1 %vm439_vm0, %v420_v12  ;;  %2496 = vmatpush3.msra.mxu1 %v732_v4  ;;  %v1029_v36 = vld [vmem:[%s3897_s6 + $0x18] sm:$0xff]  ;;  %v3258_v37 = vld [vmem:[%s3894_s3] ss:$0 sm:$0xff] }
  0x21   : > { %2497 = vmatprep.subr.mxu1 %v731_v13  ;;  %2541 = vmatprep.subr.mxu0 %v1033_v32 }
  0x22   : > { %2469 = vmatmul.mubr.msk.f32.gmra.mxu0 %vm439_vm0, %v411_v8  ;;  %2498 = vmatpush3.msra.mxu1 %v731_v13 }
  0x23   : > { %2471 = vmatprep.mubr.msk.f32.mxu0 %vm439_vm0, %v412_v11  ;;  %2484 = vmatmul.mubr.msk.f32.gmra.mxu1 %vm439_vm0, %v421_v14 }
  0x24   : > { %2486 = vmatprep.mubr.msk.f32.mxu1 %vm439_vm0, %v422_v16  ;;  %2499 = vmatprep.subr.mxu1 %v730_v18 }
  0x25   : > { %2500 = vmatpush3.msra.mxu1 %v730_v18  ;;  %2542 = vmatpush3.msra.mxu0 %v1033_v32 }
  0x26   : > { %2472 = vmatmul.mubr.msk.f32.gmra.mxu0 %vm439_vm0, %v413_v15  ;;  %2501 = vmatprep.subr.mxu1 %v729_v23 }
  0x27   : > { %2474 = vmatprep.mubr.msk.f32.mxu0 %vm439_vm0, %v414_v17  ;;  %2487 = vmatmul.mubr.msk.f32.gmra.mxu1 %vm439_vm0, %v423_v19 }
  0x28   : > { %2489 = vmatprep.mubr.msk.f32.mxu1 %vm439_vm0, %v424_v21  ;;  %2502 = vmatpush3.msra.mxu1 %v729_v23 }
  0x29   : > { %2503 = vmatprep.subr.mxu1 %v728_v27  ;;  %2543 = vmatprep.subr.mxu0 %v1032_v33 }
  0x2a   : > { %2475 = vmatmul.mubr.msk.f32.gmra.mxu0 %vm439_vm0, %v415_v20  ;;  %2504 = vmatpush3.msra.mxu1 %v728_v27 }
  0x2b   : > { %2477 = vmatprep.mubr.msk.f32.mxu0 %vm439_vm0, %v416_v22  ;;  %2490 = vmatmul.mubr.msk.f32.gmra.mxu1 %vm439_vm0, %v425_v24 }
  0x2c   : > { %2492 = vmatprep.mubr.msk.f32.mxu1 %vm439_vm0, %v426_v26  ;;  %2505 = vmatprep.subr.mxu1 %v727_v29 }
  0x2d   : > { %2506 = vmatpush3.msra.mxu1 %v727_v29  ;;  %2544 = vmatpush3.msra.mxu0 %v1032_v33 }
  0x2e   : > { %2478 = vmatmul.mubr.msk.f32.gmra.mxu0 %vm439_vm0, %v417_v25  ;;  %2507 = vmatprep.subr.mxu1 %v726_v30 }
  0x2f   : > { %2493 = vmatmul.mubr.msk.f32.gmra.mxu1 %vm439_vm0, %v427_v28  ;;  %2545 = vmatprep.subr.mxu0 %v1031_v34 }
  0x30   : > { %2508 = vmatpush3.msra.mxu1 %v726_v30  ;;  %2546 = vmatpush3.msra.mxu0 %v1031_v34 }
  0x31   : > { %2509 = vmatprep.subr.mxu1 %v725_v31  ;;  %2547 = vmatprep.subr.mxu0 %v1030_v35 }
  0x32   : > { %2510 = vmatpush3.msra.mxu1 %v725_v31  ;;  %2548 = vmatpush3.msra.mxu0 %v1030_v35 }
  0x33   : > { %2549 = vmatprep.subr.mxu0 %v1029_v36 }
  0x34   : > { %2550 = vmatpush3.msra.mxu0 %v1029_v36 }
  0xde   : > { %v2467_v38 = vpop.f32.mrf.mxu0 }
  0xdf   : > { %v572_v39 = vadd.f32 %v2467_v38, %v3258_v37  ;;  %v2482_v42 = vpop.f32.mrf.mxu1 }
  0xe0   : > { %v566_v40 = vpop.f32.mrf.mxu0  ;;  %v622_v20 = vadd.f32 %v2482_v42, %v3258_v37 }
  0xe1   : > { %v567_v41 = vadd.f32 %v3258_v37, %v566_v40  ;;  %v686_v43 = vmul.f32 0.01, %v572_v39  ;;  %vm666_vm2 = vcmp.gt.f32.partialorder %v572_v39, 0.0  ;;  %v616_v47 = vpop.f32.mrf.mxu1 }
  0xe2   : > { %v2470_v44 = vpop.f32.mrf.mxu0  ;;  %v617_v7 = vadd.f32 %v3258_v37, %v616_v47  ;;  %v696_v28 = vmul.f32 0.01, %v622_v20  ;;  %vm676_vm14 = vcmp.gt.f32.partialorder %v622_v20, 0.0 }
  0xe3   : > { %vm665_vm3 = vcmp.gt.f32.partialorder %v567_v41, 0.0  ;;  %v685_v45 = vmul.f32 0.01, %v567_v41  ;;  %v582_v46 = vadd.f32 %v2470_v44, %v3258_v37  ;;  %v2485_v51 = vpop.f32.mrf.mxu1  ;;  %v706_v52 = vsel %vm666_vm2, %v572_v39, %v686_v43 }
  0xe4   : > { %v576_v48 = vpop.f32.mrf.mxu0  ;;  %v695_v16 = vmul.f32 0.01, %v617_v7  ;;  %vm675_vm10 = vcmp.gt.f32.partialorder %v617_v7, 0.0  ;;  %v632_v29 = vadd.f32 %v2485_v51, %v3258_v37  ;;  %v716_v38 = vsel %vm676_vm14, %v622_v20, %v696_v28 }
  0xe5   : > { %v577_v49 = vadd.f32 %v3258_v37, %v576_v48  ;;  %v705_v50 = vsel %vm665_vm3, %v567_v41, %v685_v45  ;;  %v688_v53 = vmul.f32 0.01, %v582_v46  ;;  %vm668_vm4 = vcmp.gt.f32.partialorder %v582_v46, 0.0  ;;  %v626_v57 = vpop.f32.mrf.mxu1 }
  0xe6   : > { %v2473_v54 = vpop.f32.mrf.mxu0  ;;  %2511 = vmatprep.mubr.msk.f32.mxu1 %vm740_vm1, %v705_v50  ;;  %v627_v18 = vadd.f32 %v3258_v37, %v626_v57  ;;  %v715_v26 = vsel %vm675_vm10, %v617_v7, %v695_v16  ;;  %v698_v35 = vmul.f32 0.01, %v632_v29  ;;  %vm678_vm0 = vcmp.gt.f32.partialorder %v632_v29, 0.0  ;;  %v3312_v57 = vld [vmem:[%s3896_s5] ss:$0 sm:$0xff] }
  0xe7   : > { %vm667_vm5 = vcmp.gt.f32.partialorder %v577_v49, 0.0  ;;  %v687_v55 = vmul.f32 0.01, %v577_v49  ;;  %v592_v56 = vadd.f32 %v2473_v54, %v3258_v37  ;;  %2512 = vmatmul.mubr.msk.f32.vlgmr.msra.gmra.mxu1 %vm740_vm1, %v706_v52  ;;  %v2488_v61 = vpop.f32.mrf.mxu1  ;;  %v708_v0 = vsel %vm668_vm4, %v582_v46, %v688_v53 }
  0xe8   : > { %v586_v58 = vpop.f32.mrf.mxu0  ;;  %v697_v24 = vmul.f32 0.01, %v627_v18  ;;  %vm677_vm13 = vcmp.gt.f32.partialorder %v627_v18, 0.0  ;;  %v642_v36 = vadd.f32 %v2488_v61, %v3258_v37  ;;  %v718_v45 = vsel %vm678_vm0, %v632_v29, %v698_v35 }
  0xe9   : > { %v587_v59 = vadd.f32 %v3258_v37, %v586_v58  ;;  %v707_v60 = vsel %vm667_vm5, %v577_v49, %v687_v55  ;;  %v690_v62 = vmul.f32 0.01, %v592_v56  ;;  %vm670_vm6 = vcmp.gt.f32.partialorder %v592_v56, 0.0  ;;  %v636_v3 = vpop.f32.mrf.mxu1  ;;  %v1027_v55 = vld [vmem:[%s3897_s6 + $0x8] sm:$0xff] }
  0xea   : > { %v2476_v63 = vpop.f32.mrf.mxu0  ;;  %2514 = vmatprep.mubr.msk.f32.mxu1 %vm740_vm1, %v707_v60  ;;  %v637_v27 = vadd.f32 %v3258_v37, %v636_v3  ;;  %v717_v33 = vsel %vm677_vm13, %v627_v18, %v697_v24  ;;  %v700_v43 = vmul.f32 0.01, %v642_v36  ;;  %vm680_vm3 = vcmp.gt.f32.partialorder %v642_v36, 0.0 }
  0xeb   : > { %vm669_vm7 = vcmp.gt.f32.partialorder %v587_v59, 0.0  ;;  %v689_v1 = vmul.f32 0.01, %v587_v59  ;;  %v602_v2 = vadd.f32 %v2476_v63, %v3258_v37  ;;  %2515 = vmatmul.mubr.msk.f32.gmra.mxu1 %vm740_vm1, %v708_v0  ;;  %v710_v10 = vsel %vm670_vm6, %v592_v56, %v690_v62  ;;  %v2491_v11 = vpop.f32.mrf.mxu1  ;;  %v1026_v56 = vld [vmem:[%s3897_s6] sm:$0xff] }
  0xec   : > { %v596_v4 = vpop.f32.mrf.mxu0  ;;  %v699_v32 = vmul.f32 0.01, %v637_v27  ;;  %vm679_vm15 = vcmp.gt.f32.partialorder %v637_v27, 0.0  ;;  %v652_v44 = vadd.f32 %v2491_v11, %v3258_v37  ;;  %v720_v50 = vsel %vm680_vm3, %v642_v36, %v700_v43 }
  0xed   : > { %v597_v5 = vadd.f32 %v3258_v37, %v596_v4  ;;  %v709_v6 = vsel %vm669_vm7, %v587_v59, %v689_v1  ;;  %v692_v8 = vmul.f32 0.01, %v602_v2  ;;  %vm672_vm8 = vcmp.gt.f32.partialorder %v602_v2, 0.0  ;;  %v646_v22 = vpop.f32.mrf.mxu1 }
  0xee   : > { %v2479_v9 = vpop.f32.mrf.mxu0  ;;  %2517 = vmatprep.mubr.msk.f32.mxu1 %vm740_vm1, %v709_v6  ;;  %v647_v34 = vadd.f32 %v3258_v37, %v646_v22  ;;  %v719_v41 = vsel %vm679_vm15, %v637_v27, %v699_v32  ;;  %v702_v48 = vmul.f32 0.01, %v652_v44  ;;  %vm682_vm5 = vcmp.gt.f32.partialorder %v652_v44, 0.0 }
  0xef   : > { %vm671_vm9 = vcmp.gt.f32.partialorder %v597_v5, 0.0  ;;  %v691_v12 = vmul.f32 0.01, %v597_v5  ;;  %v612_v13 = vadd.f32 %v2479_v9, %v3258_v37  ;;  %2518 = vmatmul.mubr.msk.f32.gmra.mxu1 %vm740_vm1, %v710_v10  ;;  %v712_v21 = vsel %vm672_vm8, %v602_v2, %v692_v8  ;;  %v2494_v31 = vpop.f32.mrf.mxu1 }
  0xf0   : > { %v606_v14 = vpop.f32.mrf.mxu0  ;;  %v701_v40 = vmul.f32 0.01, %v647_v34  ;;  %vm681_vm2 = vcmp.gt.f32.partialorder %v647_v34, 0.0  ;;  %v662_v49 = vadd.f32 %v2494_v31, %v3258_v37  ;;  %v722_v53 = vsel %vm682_vm5, %v652_v44, %v702_v48 }
  0xf1   : > { %v607_v15 = vadd.f32 %v3258_v37, %v606_v14  ;;  %v711_v17 = vsel %vm671_vm9, %v597_v5, %v691_v12  ;;  %v694_v19 = vmul.f32 0.01, %v612_v13  ;;  %vm674_vm11 = vcmp.gt.f32.partialorder %v612_v13, 0.0  ;;  %v656_v39 = vpop.f32.mrf.mxu1 }
  0xf2   : > { %2520 = vmatprep.mubr.msk.f32.mxu1 %vm740_vm1, %v711_v17  ;;  %v657_v42 = vadd.f32 %v3258_v37, %v656_v39  ;;  %v721_v47 = vsel %vm681_vm2, %v647_v34, %v701_v40  ;;  %v704_v52 = vmul.f32 0.01, %v662_v49  ;;  %vm684_vm6 = vcmp.gt.f32.partialorder %v662_v49, 0.0  ;;  %v1028_v37 = vld [vmem:[%s3897_s6 + $0x10] sm:$0xff] }
  0xf3   : > { %vm673_vm12 = vcmp.gt.f32.partialorder %v607_v15, 0.0  ;;  %v693_v23 = vmul.f32 0.01, %v607_v15  ;;  %2521 = vmatmul.mubr.msk.f32.gmra.mxu1 %vm740_vm1, %v712_v21  ;;  %v714_v30 = vsel %vm674_vm11, %v612_v13, %v694_v19  ;;  %2551 = vmatprep.subr.mxu0 %v1028_v37 }
  0xf4   : > { %v703_v46 = vmul.f32 0.01, %v657_v42  ;;  %vm683_vm4 = vcmp.gt.f32.partialorder %v657_v42, 0.0  ;;  %v724_v54 = vsel %vm684_vm6, %v662_v49, %v704_v52  ;;  %2552 = vmatpush3.msra.mxu0 %v1028_v37 }
  0xf5   : > { %v713_v25 = vsel %vm673_vm12, %v607_v15, %v693_v23  ;;  %2553 = vmatprep.subr.mxu0 %v1027_v55 }
  0xf6   : > { %2523 = vmatprep.mubr.msk.f32.mxu1 %vm740_vm1, %v713_v25  ;;  %v723_v51 = vsel %vm683_vm4, %v657_v42, %v703_v46  ;;  %2554 = vmatpush3.msra.mxu0 %v1027_v55 }
  0xf7   : > { %2524 = vmatmul.mubr.msk.f32.gmra.mxu1 %vm740_vm1, %v714_v30  ;;  %2555 = vmatprep.subr.mxu0 %v1026_v56 }
  0xf8   : > { %2526 = vmatprep.mubr.msk.f32.mxu1 %vm740_vm1, %v715_v26  ;;  %2556 = vmatpush3.msra.mxu0 %v1026_v56 }
  0xfb   : > { %2527 = vmatmul.mubr.msk.f32.gmra.mxu1 %vm740_vm1, %v716_v38 }
  0xfc   : > { %2529 = vmatprep.mubr.msk.f32.mxu1 %vm740_vm1, %v717_v33 }
  0xff   : > { %2530 = vmatmul.mubr.msk.f32.gmra.mxu1 %vm740_vm1, %v718_v45 }
 0x100   : > { %2532 = vmatprep.mubr.msk.f32.mxu1 %vm740_vm1, %v719_v41 }
 0x103   : > { %2533 = vmatmul.mubr.msk.f32.gmra.mxu1 %vm740_vm1, %v720_v50 }
 0x104   : > { %2535 = vmatprep.mubr.msk.f32.mxu1 %vm740_vm1, %v721_v47 }
 0x107   : > { %2536 = vmatmul.mubr.msk.f32.gmra.mxu1 %vm740_vm1, %v722_v53 }
 0x108   : > { %2538 = vmatprep.mubr.msk.f32.mxu1 %vm740_vm1, %v723_v51 }
 0x10b   : > { %2539 = vmatmul.mubr.msk.f32.gmra.mxu1 %vm740_vm1, %v724_v54 }
 0x1a7   : > { %v2513_v58 = vpop.f32.mrf.mxu1 }
 0x1a8   : > { %v873_v59 = vadd.f32 %v2513_v58, %v3312_v57 }
 0x1a9   : > { %v867_v60 = vpop.f32.mrf.mxu1 }
 0x1aa   : > { %v868_v61 = vadd.f32 %v3312_v57, %v867_v60  ;;  %v987_v62 = vmul.f32 0.01, %v873_v59  ;;  %vm967_vm7 = vcmp.gt.f32.partialorder %v873_v59, 0.0 }
 0x1ab   : > { %v2516_v63 = vpop.f32.mrf.mxu1 }
 0x1ac   : > { %vm966_vm8 = vcmp.gt.f32.partialorder %v868_v61, 0.0  ;;  %v986_v0 = vmul.f32 0.01, %v868_v61  ;;  %v883_v1 = vadd.f32 %v2516_v63, %v3312_v57  ;;  %v1007_v5 = vsel %vm967_vm7, %v873_v59, %v987_v62 }
 0x1ad   : > { %v877_v2 = vpop.f32.mrf.mxu1 }
 0x1ae   : > { %v878_v3 = vadd.f32 %v3312_v57, %v877_v2  ;;  %v1006_v4 = vsel %vm966_vm8, %v868_v61, %v986_v0  ;;  %v989_v6 = vmul.f32 0.01, %v883_v1  ;;  %vm969_vm9 = vcmp.gt.f32.partialorder %v883_v1, 0.0 }
 0x1af   : > { %v2519_v7 = vpop.f32.mrf.mxu1  ;;  %2557 = vmatprep.mubr.msk.f32.mxu0 %vm740_vm1, %v1006_v4 }
 0x1b0   : > { %vm968_vm10 = vcmp.gt.f32.partialorder %v878_v3, 0.0  ;;  %v988_v8 = vmul.f32 0.01, %v878_v3  ;;  %v893_v9 = vadd.f32 %v2519_v7, %v3312_v57  ;;  %2558 = vmatmul.mubr.msk.f32.vlgmr.msra.gmra.mxu0 %vm740_vm1, %v1007_v5  ;;  %v1009_v15 = vsel %vm969_vm9, %v883_v1, %v989_v6 }
 0x1b1   : > { %v887_v10 = vpop.f32.mrf.mxu1 }
 0x1b2   : > { %v888_v11 = vadd.f32 %v3312_v57, %v887_v10  ;;  %v1008_v12 = vsel %vm968_vm10, %v878_v3, %v988_v8  ;;  %v991_v13 = vmul.f32 0.01, %v893_v9  ;;  %vm971_vm11 = vcmp.gt.f32.partialorder %v893_v9, 0.0 }
 0x1b3   : > { %v2522_v14 = vpop.f32.mrf.mxu1  ;;  %2560 = vmatprep.mubr.msk.f32.mxu0 %vm740_vm1, %v1008_v12 }
 0x1b4   : > { %vm970_vm12 = vcmp.gt.f32.partialorder %v888_v11, 0.0  ;;  %v990_v16 = vmul.f32 0.01, %v888_v11  ;;  %v903_v17 = vadd.f32 %v2522_v14, %v3312_v57  ;;  %2561 = vmatmul.mubr.msk.f32.gmra.mxu0 %vm740_vm1, %v1009_v15  ;;  %v1011_v23 = vsel %vm971_vm11, %v893_v9, %v991_v13  ;;  %v1290_v13 = vld [vmem:[%s3359_s20 + $0x18] sm:$0xff]  ;;  %v1289_v15 = vld [vmem:[%s3359_s20 + $0x10] sm:$0xff] }
 0x1b5   : > { %v897_v18 = vpop.f32.mrf.mxu1 }
 0x1b6   : > { %v898_v19 = vadd.f32 %v3312_v57, %v897_v18  ;;  %v1010_v20 = vsel %vm970_vm12, %v888_v11, %v990_v16  ;;  %v993_v21 = vmul.f32 0.01, %v903_v17  ;;  %vm973_vm13 = vcmp.gt.f32.partialorder %v903_v17, 0.0  ;;  %v1287_v11 = vld [vmem:[%s3359_s20] sm:$0xff] }
 0x1b7   : > { %v2525_v22 = vpop.f32.mrf.mxu1  ;;  %2563 = vmatprep.mubr.msk.f32.mxu0 %vm740_vm1, %v1010_v20  ;;  %v1307_v14 = vmax.f32 %v1287_v11, 1e-07  ;;  %v1309_v18 = vmax.f32 %v1289_v15, 1e-07 }
 0x1b8   : > { %vm972_vm14 = vcmp.gt.f32.partialorder %v898_v19, 0.0  ;;  %v992_v24 = vmul.f32 0.01, %v898_v19  ;;  %v913_v25 = vadd.f32 %v2525_v22, %v3312_v57  ;;  %2564 = vmatmul.mubr.msk.f32.gmra.mxu0 %vm740_vm1, %v1011_v23  ;;  %v1013_v31 = vsel %vm973_vm13, %v903_v17, %v993_v21  ;;  %v1291_v21 = vld [vmem:[%s3359_s20 + $0x20] sm:$0xff] }
 0x1b9   : > { %v907_v26 = vpop.f32.mrf.mxu1  ;;  %v1310_v17 = vmax.f32 %v1290_v13, 1e-07  ;;  %v1327_v20 = vmin.f32 %v1307_v14, 0.9999999 }
 0x1ba   : > { %v908_v27 = vadd.f32 %v3312_v57, %v907_v26  ;;  %v1012_v28 = vsel %vm972_vm14, %v898_v19, %v992_v24  ;;  %v995_v29 = vmul.f32 0.01, %v913_v25  ;;  %vm975_vm15 = vcmp.gt.f32.partialorder %v913_v25, 0.0  ;;  %v1292_v19 = vld [vmem:[%s3359_s20 + $0x28] sm:$0xff]  ;;  %v1294_v26 = vld [vmem:[%s3359_s20 + $0x38] sm:$0xff] }
 0x1bb   : > { %v2528_v30 = vpop.f32.mrf.mxu1  ;;  %2566 = vmatprep.mubr.msk.f32.mxu0 %vm740_vm1, %v1012_v28  ;;  %v1330_v22 = vmin.f32 %v1310_v17, 0.9999999  ;;  %v1312_v23 = vmax.f32 %v1292_v19, 1e-07  ;;  %v1329_v24 = vmin.f32 %v1309_v18, 0.9999999 }
 0x1bc   : > { %vm974_vm0 = vcmp.gt.f32.partialorder %v908_v27, 0.0  ;;  %v994_v32 = vmul.f32 0.01, %v908_v27  ;;  %v923_v33 = vadd.f32 %v2528_v30, %v3312_v57  ;;  %2567 = vmatmul.mubr.msk.f32.gmra.mxu0 %vm740_vm1, %v1013_v31  ;;  %v1015_v40 = vsel %vm975_vm15, %v913_v25, %v995_v29  ;;  %v1306_v19 = vld [vmem:[%s3359_s20 + $0x98] sm:$0xff] }
 0x1bd   : > { %v917_v34 = vpop.f32.mrf.mxu1  ;;  %v1311_v25 = vmax.f32 %v1291_v21, 1e-07  ;;  %v1332_v28 = vmin.f32 %v1312_v23, 0.9999999  ;;  %v1314_v29 = vmax.f32 %v1294_v26, 1e-07 }
 0x1be   : > { %v918_v35 = vadd.f32 %v3312_v57, %v917_v34  ;;  %v1014_v36 = vsel %vm974_vm0, %v908_v27, %v994_v32  ;;  %v997_v38 = vmul.f32 0.01, %v923_v33  ;;  %vm977_vm2 = vcmp.gt.f32.partialorder %v923_v33, 0.0  ;;  %v1293_v27 = vld [vmem:[%s3359_s20 + $0x30] sm:$0xff]  ;;  %v1296_v32 = vld [vmem:[%s3359_s20 + $0x48] sm:$0xff]  ;;  %v1295_v34 = vld [vmem:[%s3359_s20 + $0x40] sm:$0xff] }
 0x1bf   : > { %v2531_v39 = vpop.f32.mrf.mxu1  ;;  %2569 = vmatprep.mubr.msk.f32.mxu0 %vm740_vm1, %v1014_v36  ;;  %v1331_v30 = vmin.f32 %v1311_v25, 0.9999999  ;;  %v1313_v31 = vmax.f32 %v1293_v27, 1e-07  ;;  %v1316_v36 = vmax.f32 %v1296_v32, 1e-07 }
 0x1c0   : > { %vm976_vm3 = vcmp.gt.f32.partialorder %v918_v35, 0.0  ;;  %v996_v41 = vmul.f32 0.01, %v918_v35  ;;  %v933_v42 = vadd.f32 %v2531_v39, %v3312_v57  ;;  %2570 = vmatmul.mubr.msk.f32.gmra.mxu0 %vm740_vm1, %v1015_v40  ;;  %v1017_v48 = vsel %vm977_vm2, %v923_v33, %v997_v38  ;;  %v1298_v39 = vld [vmem:[%s3359_s20 + $0x58] sm:$0xff]  ;;  %v1297_v40 = vld [vmem:[%s3359_s20 + $0x50] sm:$0xff] }
 0x1c1   : > { %v927_v43 = vpop.f32.mrf.mxu1  ;;  %v1334_v33 = vmin.f32 %v1314_v29, 0.9999999  ;;  %v1315_v38 = vmax.f32 %v1295_v34, 1e-07  ;;  %v1326_v26 = vmax.f32 %v1306_v19, 1e-07 }
 0x1c2   : > { %v928_v44 = vadd.f32 %v3312_v57, %v927_v43  ;;  %v1016_v45 = vsel %vm976_vm3, %v918_v35, %v996_v41  ;;  %v999_v46 = vmul.f32 0.01, %v933_v42  ;;  %vm979_vm4 = vcmp.gt.f32.partialorder %v933_v42, 0.0 }
 0x1c3   : > { %v2534_v47 = vpop.f32.mrf.mxu1  ;;  %2572 = vmatprep.mubr.msk.f32.mxu0 %vm740_vm1, %v1016_v45  ;;  %v1333_v35 = vmin.f32 %v1313_v31, 0.9999999  ;;  %v1318_v43 = vmax.f32 %v1298_v39, 1e-07  ;;  %v1346_v34 = vmin.f32 %v1326_v26, 0.9999999 }
 0x1c4   : > { %vm978_vm5 = vcmp.gt.f32.partialorder %v928_v44, 0.0  ;;  %v998_v49 = vmul.f32 0.01, %v928_v44  ;;  %v943_v50 = vadd.f32 %v2534_v47, %v3312_v57  ;;  %2573 = vmatmul.mubr.msk.f32.gmra.mxu0 %vm740_vm1, %v1017_v48  ;;  %v1019_v55 = vsel %vm979_vm4, %v933_v42, %v999_v46 }
 0x1c5   : > { %v937_v51 = vpop.f32.mrf.mxu1  ;;  %v1336_v42 = vmin.f32 %v1316_v36, 0.9999999  ;;  %v1335_v46 = vmin.f32 %v1315_v38, 0.9999999  ;;  %v1317_v47 = vmax.f32 %v1297_v40, 1e-07 }
 0x1c6   : > { %v938_v52 = vadd.f32 %v3312_v57, %v937_v51  ;;  %v1018_v53 = vsel %vm978_vm5, %v928_v44, %v998_v49  ;;  %v1001_v54 = vmul.f32 0.01, %v943_v50  ;;  %vm981_vm6 = vcmp.gt.f32.partialorder %v943_v50, 0.0  ;;  %v1300_v44 = vld [vmem:[%s3359_s20 + $0x68] sm:$0xff]  ;;  %v1299_v49 = vld [vmem:[%s3359_s20 + $0x60] sm:$0xff] }
 0x1c7   : > { %v2537_v37 = vpop.f32.mrf.mxu1  ;;  %2575 = vmatprep.mubr.msk.f32.mxu0 %vm740_vm1, %v1018_v53  ;;  %v1320_v51 = vmax.f32 %v1300_v44, 1e-07 }
 0x1c8   : > { %vm980_vm7 = vcmp.gt.f32.partialorder %v938_v52, 0.0  ;;  %v1000_v56 = vmul.f32 0.01, %v938_v52  ;;  %v953_v58 = vadd.f32 %v2537_v37, %v3312_v57  ;;  %2576 = vmatmul.mubr.msk.f32.gmra.mxu0 %vm740_vm1, %v1019_v55  ;;  %v1021_v0 = vsel %vm981_vm6, %v943_v50, %v1001_v54 }
 0x1c9   : > { %v947_v59 = vpop.f32.mrf.mxu1  ;;  %v1338_v54 = vmin.f32 %v1318_v43, 0.9999999  ;;  %v1337_v37 = vmin.f32 %v1317_v47, 0.9999999  ;;  %v1319_v55 = vmax.f32 %v1299_v49, 1e-07 }
 0x1ca   : > { %v948_v60 = vadd.f32 %v3312_v57, %v947_v59  ;;  %v1020_v61 = vsel %vm980_vm7, %v938_v52, %v1000_v56  ;;  %v1003_v62 = vmul.f32 0.01, %v953_v58  ;;  %vm983_vm8 = vcmp.gt.f32.partialorder %v953_v58, 0.0  ;;  %v1302_v56 = vld [vmem:[%s3359_s20 + $0x78] sm:$0xff] }
 0x1cb   : > { %v2540_v63 = vpop.f32.mrf.mxu1  ;;  %2578 = vmatprep.mubr.msk.f32.mxu0 %vm740_vm1, %v1020_v61 }
 0x1cc   : > { %vm982_vm9 = vcmp.gt.f32.partialorder %v948_v60, 0.0  ;;  %v1002_v1 = vmul.f32 0.01, %v948_v60  ;;  %v963_v2 = vadd.f32 %v2540_v63, %v3312_v57  ;;  %2579 = vmatmul.mubr.msk.f32.gmra.mxu0 %vm740_vm1, %v1021_v0  ;;  %v1023_v7 = vsel %vm983_vm8, %v953_v58, %v1003_v62 }
 0x1cd   : > { %v957_v3 = vpop.f32.mrf.mxu1  ;;  %v1340_v63 = vmin.f32 %v1320_v51, 0.9999999 }
 0x1ce   : > { %v958_v4 = vadd.f32 %v3312_v57, %v957_v3  ;;  %v1022_v5 = vsel %vm982_vm9, %v948_v60, %v1002_v1  ;;  %v1005_v6 = vmul.f32 0.01, %v963_v2  ;;  %vm985_vm10 = vcmp.gt.f32.partialorder %v963_v2, 0.0  ;;  %v1288_v57 = vld [vmem:[%s3359_s20 + $0x8] sm:$0xff]  ;;  %v1301_v60 = vld [vmem:[%s3359_s20 + $0x70] sm:$0xff] }
 0x1cf   : > { %2581 = vmatprep.mubr.msk.f32.mxu0 %vm740_vm1, %v1022_v5  ;;  %v1308_v12 = vmax.f32 %v1288_v57, 1e-07  ;;  %v1339_v3 = vmin.f32 %v1319_v55, 0.9999999  ;;  %v1304_v5 = vld [vmem:[%s3359_s20 + $0x88] sm:$0xff] }
 0x1d0   : > { %vm984_vm11 = vcmp.gt.f32.partialorder %v958_v4, 0.0  ;;  %v1004_v8 = vmul.f32 0.01, %v958_v4  ;;  %2582 = vmatmul.mubr.msk.f32.gmra.mxu0 %vm740_vm1, %v1023_v7  ;;  %v1025_v10 = vsel %vm985_vm10, %v963_v2, %v1005_v6  ;;  %v1322_v2 = vmax.f32 %v1302_v56, 1e-07 }
 0x1d1   : > { %v1328_v16 = vmin.f32 %v1308_v12, 0.9999999  ;;  %v1324_v13 = vmax.f32 %v1304_v5, 1e-07 }
 0x1d2   : > { %v1024_v9 = vsel %vm984_vm11, %v958_v4, %v1004_v8  ;;  %v1321_v4 = vmax.f32 %v1301_v60, 1e-07  ;;  %v1303_v8 = vld [vmem:[%s3359_s20 + $0x80] sm:$0xff]  ;;  %v1342_v12 = vmin.f32 %v1322_v2, 0.9999999 }
 0x1d3   : > { %2584 = vmatprep.mubr.msk.f32.mxu0 %vm740_vm1, %v1024_v9  ;;  %2750 = vlog2.f32 %v1328_v16  ;;  %v1323_v15 = vmax.f32 %v1303_v8, 1e-07  ;;  %v1305_v16 = vld [vmem:[%s3359_s20 + $0x90] sm:$0xff] }
 0x1d4   : > { %2585 = vmatmul.mubr.msk.f32.gmra.mxu0 %vm740_vm1, %v1025_v10  ;;  %2752 = vlog2.f32 %v1327_v20  ;;  %v1341_v14 = vmin.f32 %v1321_v4, 0.9999999  ;;  %v1325_v23 = vmax.f32 %v1305_v16, 1e-07  ;;  %vm1266_vm1 = vcmask 130048  }
 0x1d5   : > { %2754 = vlog2.f32 %v1330_v22  ;;  %v1344_v22 = vmin.f32 %v1324_v13, 0.9999999  ;;  %v1343_v25 = vmin.f32 %v1323_v15, 0.9999999 }
 0x1d6   : > { %2756 = vlog2.f32 %v1329_v24  ;;  %v1345_v31 = vmin.f32 %v1325_v23, 0.9999999 }
 0x1d7   : > { %2758 = vlog2.f32 %v1332_v28 }
 0x1d8   : > { %2760 = vlog2.f32 %v1331_v30 }
 0x1d9   : > { %2762 = vlog2.f32 %v1334_v33 }
 0x1da   : > { %2764 = vlog2.f32 %v1333_v35 }
 0x1db   : > { %2766 = vlog2.f32 %v1336_v42 }
 0x1dc   : > { %2768 = vlog2.f32 %v1335_v46  ;;  %v3387_v46 = vld [vmem:[%s3898_s7] ss:$0 sm:$0xff] }
 0x1dd   : > { %2770 = vlog2.f32 %v1338_v54 }
 0x1de   : > { %2772 = vlog2.f32 %v1337_v37 }
 0x1e0   : > { %v2751_v41 = vpop.eup %2750 }
 0x1e1   : > { %v2753_v45 = vpop.eup %2752  ;;  %v1350_v48 = vmul.f32 0.6931472, %v2751_v41 }
 0x1e2   : > { %v2755_v50 = vpop.eup %2754  ;;  %v1348_v53 = vmul.f32 0.6931472, %v2753_v45 }
 0x1e3   : > { %v2757_v52 = vpop.eup %2756  ;;  %v1388_v58 = vsub.f32 0.0, %v1350_v48  ;;  %v1354_v59 = vmul.f32 0.6931472, %v2755_v50 }
 0x1e4   : > { %v2759_v61 = vpop.eup %2758  ;;  %v1352_v62 = vmul.f32 0.6931472, %v2757_v52  ;;  %v1387_v1 = vsub.f32 0.0, %v1348_v53 }
 0x1e5   : > { %v2761_v0 = vpop.eup %2760  ;;  %2774 = vlog2.f32 %v1388_v58  ;;  %v1390_v6 = vsub.f32 0.0, %v1354_v59  ;;  %v1358_v7 = vmul.f32 0.6931472, %v2759_v61 }
 0x1e6   : > { %v2763_v9 = vpop.eup %2762  ;;  %v1389_v10 = vsub.f32 0.0, %v1352_v62  ;;  %v1356_v57 = vmul.f32 0.6931472, %v2761_v0  ;;  %2776 = vlog2.f32 %v1340_v63 }
 0x1e7   : > { %v2765_v11 = vpop.eup %2764  ;;  %2778 = vlog2.f32 %v1387_v1  ;;  %v1392_v17 = vsub.f32 0.0, %v1358_v7  ;;  %v1362_v18 = vmul.f32 0.6931472, %v2763_v9 }
 0x1e8   : > { %2780 = vlog2.f32 %v1339_v3  ;;  %v1391_v20 = vsub.f32 0.0, %v1356_v57  ;;  %v1360_v21 = vmul.f32 0.6931472, %v2765_v11  ;;  %v2767_v24 = vpop.eup %2766 }
 0x1e9   : > { %2782 = vlog2.f32 %v1390_v6  ;;  %v2769_v27 = vpop.eup %2768  ;;  %v1394_v28 = vsub.f32 0.0, %v1362_v18  ;;  %v1366_v30 = vmul.f32 0.6931472, %v2767_v24 }
 0x1ea   : > { %2784 = vlog2.f32 %v1389_v10  ;;  %v1393_v29 = vsub.f32 0.0, %v1360_v21  ;;  %v2771_v32 = vpop.eup %2770  ;;  %v1364_v33 = vmul.f32 0.6931472, %v2769_v27 }
 0x1eb   : > { %2786 = vlog2.f32 %v1342_v12  ;;  %v2773_v35 = vpop.eup %2772  ;;  %v1396_v39 = vsub.f32 0.0, %v1366_v30  ;;  %v1370_v40 = vmul.f32 0.6931472, %v2771_v32 }
 0x1ec   : > { %2788 = vlog2.f32 %v1341_v14  ;;  %v1395_v42 = vsub.f32 0.0, %v1364_v33  ;;  %v1368_v43 = vmul.f32 0.6931472, %v2773_v35 }
 0x1ed   : > { %2790 = vlog2.f32 %v1392_v17  ;;  %v1398_v50 = vsub.f32 0.0, %v1370_v40 }
 0x1ee   : > { %2792 = vlog2.f32 %v1391_v20  ;;  %v1397_v53 = vsub.f32 0.0, %v1368_v43 }
 0x1ef   : > { %2794 = vlog2.f32 %v1344_v22 }
 0x1f0   : > { %2796 = vlog2.f32 %v1343_v25 }
 0x1f1   : > { %2798 = vlog2.f32 %v1394_v28 }
 0x1f2   : > { %v2775_v36 = vpop.eup %2774  ;;  %2800 = vlog2.f32 %v1393_v29 }
 0x1f3   : > { %v2777_v38 = vpop.eup %2776  ;;  %2802 = vlog2.f32 %v1345_v31  ;;  %v1410_v49 = vmul.f32 0.6931472, %v2775_v36 }
 0x1f4   : > { %v2779_v41 = vpop.eup %2778  ;;  %2804 = vlog2.f32 %v1346_v34  ;;  %v1374_v47 = vmul.f32 0.6931472, %v2777_v38 }
 0x1f5   : > { %v2781_v44 = vpop.eup %2780  ;;  %2806 = vlog2.f32 %v1396_v39  ;;  %v1408_v56 = vmul.f32 0.6931472, %v2779_v41 }
 0x1f6   : > { %v2783_v45 = vpop.eup %2782  ;;  %2808 = vlog2.f32 %v1395_v42  ;;  %v1372_v54 = vmul.f32 0.6931472, %v2781_v44  ;;  %v1400_v61 = vsub.f32 0.0, %v1374_v47 }
 0x1f7   : > { %v2785_v48 = vpop.eup %2784  ;;  %v1414_v60 = vmul.f32 0.6931472, %v2783_v45  ;;  %2810 = vlog2.f32 %v1398_v50 }
 0x1f8   : > { %v2787_v51 = vpop.eup %2786  ;;  %2812 = vlog2.f32 %v1397_v53  ;;  %v1399_v4 = vsub.f32 0.0, %v1372_v54  ;;  %v1412_v10 = vmul.f32 0.6931472, %v2785_v48 }
 0x1f9   : > { %v2789_v37 = vpop.eup %2788  ;;  %v1378_v1 = vmul.f32 0.6931472, %v2787_v51  ;;  %2814 = vlog2.f32 %v1400_v61 }
 0x1fa   : > { %v2791_v58 = vpop.eup %2790  ;;  %v1376_v5 = vmul.f32 0.6931472, %v2789_v37  ;;  %2816 = vlog2.f32 %v1399_v4 }
 0x1fb   : > { %v2793_v62 = vpop.eup %2792  ;;  %v1418_v12 = vmul.f32 0.6931472, %v2791_v58  ;;  %v1402_v16 = vsub.f32 0.0, %v1378_v1 }
 0x1fc   : > { %v2795_v2 = vpop.eup %2794  ;;  %v1416_v20 = vmul.f32 0.6931472, %v2793_v62  ;;  %v1401_v21 = vsub.f32 0.0, %v1376_v5 }
 0x1fd   : > { %v2797_v6 = vpop.eup %2796  ;;  %v1382_v17 = vmul.f32 0.6931472, %v2795_v2  ;;  %2818 = vlog2.f32 %v1402_v16 }
 0x1fe   : > { %v2799_v57 = vpop.eup %2798  ;;  %v1380_v22 = vmul.f32 0.6931472, %v2797_v6  ;;  %2820 = vlog2.f32 %v1401_v21 }
 0x1ff   : > { %v2801_v13 = vpop.eup %2800  ;;  %v1422_v29 = vmul.f32 0.6931472, %v2799_v57  ;;  %v1404_v31 = vsub.f32 0.0, %v1382_v17 }
 0x200   : > { %v2803_v18 = vpop.eup %2802  ;;  %v1420_v35 = vmul.f32 0.6931472, %v2801_v13  ;;  %v1403_v36 = vsub.f32 0.0, %v1380_v22 }
 0x201   : > { %v2805_v23 = vpop.eup %2804  ;;  %v1384_v32 = vmul.f32 0.6931472, %v2803_v18  ;;  %2822 = vlog2.f32 %v1404_v31 }
 0x202   : > { %v2807_v33 = vpop.eup %2806  ;;  %v1386_v38 = vmul.f32 0.6931472, %v2805_v23  ;;  %2824 = vlog2.f32 %v1403_v36 }
 0x203   : > { %v2809_v39 = vpop.eup %2808  ;;  %v1405_v48 = vsub.f32 0.0, %v1384_v32 }
 0x204   : > { %v1424_v51 = vmul.f32 0.6931472, %v2809_v39  ;;  %v1406_v53 = vsub.f32 0.0, %v1386_v38 }
 0x205   : > { %2826 = vlog2.f32 %v1405_v48 }
 0x206   : > { %2828 = vlog2.f32 %v1406_v53 }
 0x270   : > { %v2559_v52 = vpop.f32.mrf.mxu0 }
 0x271   : > { %v1173_v55 = vadd.f32 %v2559_v52, %v3387_v46  ;;  %v1426_v52 = vmul.f32 0.6931472, %v2807_v33 }
 0x272   : > { %v1167_v59 = vpop.f32.mrf.mxu0 }
 0x273   : > { %1268 = vst.msk [vmem:[%s3391_s30 + $0x8] sm:$0xff] %vm1266_vm1, %v1173_v55  ;;  %v1168_v63 = vadd.f32 %v3387_v46, %v1167_v59  ;;  %v3396_v0 = vsub.f32 %v1173_v55, %v1410_v49  ;;  %v2811_v49 = vpop.eup %2810 }
 0x274   : > { %v2562_v3 = vpop.f32.mrf.mxu0  ;;  %v2813_v54 = vpop.eup %2812  ;;  %v1430_v2 = vmul.f32 0.6931472, %v2811_v49 }
 0x275   : > { %1267 = vst.msk [vmem:[%s3391_s30] sm:$0xff] %vm1266_vm1, %v1168_v63  ;;  %v1183_v7 = vadd.f32 %v2562_v3, %v3387_v46  ;;  %v1470_v8 = vsel %vm1266_vm1, %v3396_v0, -inf  ;;  %v3403_v9 = vsub.f32 %v1168_v63, %v1408_v56  ;;  %v1428_v1 = vmul.f32 0.6931472, %v2813_v54 }
 0x276   : > { %1471 = vmax.xlane.f32.xlu0 %v1470_v8  ;;  %v1177_v11 = vpop.f32.mrf.mxu0 }
 0x277   : > { %1270 = vst.msk [vmem:[%s3391_s30 + $0x18] sm:$0xff] %vm1266_vm1, %v1183_v7  ;;  %v1178_v14 = vadd.f32 %v3387_v46, %v1177_v11  ;;  %v3408_v15 = vsub.f32 %v1183_v7, %v1414_v60  ;;  %v1467_v26 = vsel %vm1266_vm1, %v3403_v9, -inf  ;;  %v2815_v60 = vpop.eup %2814 }
 0x278   : > { %v2565_v19 = vpop.f32.mrf.mxu0  ;;  %v2817_v3 = vpop.eup %2816 }
 0x279   : > { %1269 = vst.msk [vmem:[%s3391_s30 + $0x10] sm:$0xff] %vm1266_vm1, %v1178_v14  ;;  %v1193_v24 = vadd.f32 %v2565_v19, %v3387_v46  ;;  %v1476_v25 = vsel %vm1266_vm1, %v3408_v15, -inf  ;;  %v3417_v27 = vsub.f32 %v1178_v14, %v1412_v10  ;;  %v2819_v11 = vpop.eup %2818  ;;  %v1432_v13 = vmul.f32 0.6931472, %v2817_v3 }
 0x27a   : > { %1477 = vmax.xlane.f32.xlu1 %v1476_v25  ;;  %v1187_v28 = vpop.f32.mrf.mxu0  ;;  %1468 = vmax.xlane.f32.xlu0 %v1467_v26  ;;  %v1434_v14 = vmul.f32 0.6931472, %v2815_v60  ;;  %v2821_v16 = vpop.eup %2820 }
 0x27b   : > { %1272 = vst.msk [vmem:[%s3391_s30 + $0x28] sm:$0xff] %vm1266_vm1, %v1193_v24  ;;  %v1188_v30 = vadd.f32 %v3387_v46, %v1187_v28  ;;  %v1473_v41 = vsel %vm1266_vm1, %v3417_v27, -inf  ;;  %v3429_v43 = vsub.f32 %v1193_v24, %v1418_v12  ;;  %v2823_v24 = vpop.eup %2822  ;;  %v1436_v26 = vmul.f32 0.6931472, %v2821_v16 }
 0x27c   : > { %v2568_v34 = vpop.f32.mrf.mxu0  ;;  %v1438_v28 = vmul.f32 0.6931472, %v2819_v11 }
 0x27d   : > { %1271 = vst.msk [vmem:[%s3391_s30 + $0x20] sm:$0xff] %vm1266_vm1, %v1188_v30  ;;  %v1203_v40 = vadd.f32 %v2568_v34, %v3387_v46  ;;  %v3427_v42 = vsub.f32 %v1188_v30, %v1416_v20  ;;  %v1482_v55 = vsel %vm1266_vm1, %v3429_v43, -inf }
 0x27e   : > { %v1197_v44 = vpop.f32.mrf.mxu0  ;;  %1474 = vmax.xlane.f32.xlu1 %v1473_v41  ;;  %v1442_v41 = vmul.f32 0.6931472, %v2823_v24 }
 0x27f   : > { %1274 = vst.msk [vmem:[%s3391_s30 + $0x38] sm:$0xff] %vm1266_vm1, %v1203_v40  ;;  %v1198_v45 = vadd.f32 %v3387_v46, %v1197_v44  ;;  %v1479_v47 = vsel %vm1266_vm1, %v3427_v42, -inf  ;;  %v3443_v58 = vsub.f32 %v1203_v40, %v1422_v29  ;;  %v2825_v29 = vpop.eup %2824 }
 0x280   : > { %v2571_v50 = vpop.f32.mrf.mxu0  ;;  %1480 = vmax.xlane.f32.xlu0 %v1479_v47  ;;  %v2827_v38 = vpop.eup %2826  ;;  %v1440_v40 = vmul.f32 0.6931472, %v2825_v29 }
 0x281   : > { %1273 = vst.msk [vmem:[%s3391_s30 + $0x30] sm:$0xff] %vm1266_vm1, %v1198_v45  ;;  %v1213_v37 = vadd.f32 %v2571_v50, %v3387_v46  ;;  %v3441_v56 = vsub.f32 %v1198_v45, %v1420_v35  ;;  %v1488_v5 = vsel %vm1266_vm1, %v3443_v58, -inf  ;;  %v2829_v44 = vpop.eup %2828  ;;  %v1444_v54 = vmul.f32 0.6931472, %v2827_v38 }
 0x282   : > { %v1207_v59 = vpop.f32.mrf.mxu0  ;;  %1483 = vmax.xlane.f32.xlu1 %v1482_v55 }
 0x283   : > { %1276 = vst.msk [vmem:[%s3391_s30 + $0x48] sm:$0xff] %vm1266_vm1, %v1213_v37  ;;  %v1208_v61 = vadd.f32 %v3387_v46, %v1207_v59  ;;  %v1485_v62 = vsel %vm1266_vm1, %v3441_v56, -inf  ;;  %v3457_v7 = vsub.f32 %v1213_v37, %v1426_v52  ;;  %v1446_v37 = vmul.f32 0.6931472, %v2829_v44 }
 0x284   : > { %v2574_v63 = vpop.f32.mrf.mxu0  ;;  %1486 = vmax.xlane.f32.xlu0 %v1485_v62 }
 0x285   : > { %1275 = vst.msk [vmem:[%s3391_s30 + $0x40] sm:$0xff] %vm1266_vm1, %v1208_v61  ;;  %v1223_v4 = vadd.f32 %v2574_v63, %v3387_v46  ;;  %v3455_v6 = vsub.f32 %v1208_v61, %v1424_v51  ;;  %v1494_v18 = vsel %vm1266_vm1, %v3457_v7, -inf }
 0x286   : > { %v1217_v8 = vpop.f32.mrf.mxu0  ;;  %1489 = vmax.xlane.f32.xlu1 %v1488_v5 }
 0x287   : > { %1278 = vst.msk [vmem:[%s3391_s30 + $0x58] sm:$0xff] %vm1266_vm1, %v1223_v4  ;;  %v1218_v10 = vadd.f32 %v3387_v46, %v1217_v8  ;;  %v1491_v57 = vsel %vm1266_vm1, %v3455_v6, -inf  ;;  %v3471_v20 = vsub.f32 %v1223_v4, %v1430_v2 }
 0x288   : > { %v2577_v12 = vpop.f32.mrf.mxu0  ;;  %1492 = vmax.xlane.f32.xlu0 %v1491_v57 }
 0x289   : > { %1277 = vst.msk [vmem:[%s3391_s30 + $0x50] sm:$0xff] %vm1266_vm1, %v1218_v10  ;;  %v1233_v17 = vadd.f32 %v2577_v12, %v3387_v46  ;;  %v3469_v19 = vsub.f32 %v1218_v10, %v1428_v1  ;;  %v1500_v31 = vsel %vm1266_vm1, %v3471_v20, -inf }
 0x28a   : > { %v1227_v21 = vpop.f32.mrf.mxu0  ;;  %1495 = vmax.xlane.f32.xlu1 %v1494_v18 }
 0x28b   : > { %1280 = vst.msk [vmem:[%s3391_s30 + $0x68] sm:$0xff] %vm1266_vm1, %v1233_v17  ;;  %v1228_v22 = vadd.f32 %v3387_v46, %v1227_v21  ;;  %v1497_v23 = vsel %vm1266_vm1, %v3469_v19, -inf  ;;  %v3485_v33 = vsub.f32 %v1233_v17, %v1434_v14 }
 0x28c   : > { %v2580_v25 = vpop.f32.mrf.mxu0  ;;  %1498 = vmax.xlane.f32.xlu0 %v1497_v23 }
 0x28d   : > { %1279 = vst.msk [vmem:[%s3391_s30 + $0x60] sm:$0xff] %vm1266_vm1, %v1228_v22  ;;  %v1243_v30 = vadd.f32 %v2580_v25, %v3387_v46  ;;  %v3483_v32 = vsub.f32 %v1228_v22, %v1432_v13  ;;  %v1506_v47 = vsel %vm1266_vm1, %v3485_v33, -inf }
 0x28e   : > { %v1237_v34 = vpop.f32.mrf.mxu0  ;;  %1501 = vmax.xlane.f32.xlu1 %v1500_v31 }
 0x28f   : > { %1282 = vst.msk [vmem:[%s3391_s30 + $0x78] sm:$0xff] %vm1266_vm1, %v1243_v30  ;;  %v1238_v35 = vadd.f32 %v3387_v46, %v1237_v34  ;;  %v1503_v36 = vsel %vm1266_vm1, %v3483_v32, -inf  ;;  %v3499_v49 = vsub.f32 %v1243_v30, %v1438_v28 }
 0x290   : > { %v2583_v39 = vpop.f32.mrf.mxu0  ;;  %1504 = vmax.xlane.f32.xlu0 %v1503_v36 }
 0x291   : > { %1281 = vst.msk [vmem:[%s3391_s30 + $0x70] sm:$0xff] %vm1266_vm1, %v1238_v35  ;;  %v1253_v45 = vadd.f32 %v2583_v39, %v3387_v46  ;;  %v3497_v48 = vsub.f32 %v1238_v35, %v1436_v26  ;;  %v1512_v59 = vsel %vm1266_vm1, %v3499_v49, -inf }
 0x292   : > { %v1247_v50 = vpop.f32.mrf.mxu0  ;;  %1507 = vmax.xlane.f32.xlu1 %v1506_v47 }
 0x293   : > { %1284 = vst.msk [vmem:[%s3391_s30 + $0x88] sm:$0xff] %vm1266_vm1, %v1253_v45  ;;  %v1248_v51 = vadd.f32 %v3387_v46, %v1247_v50  ;;  %v1509_v52 = vsel %vm1266_vm1, %v3497_v48, -inf  ;;  %v3513_v61 = vsub.f32 %v1253_v45, %v1442_v41 }
 0x294   : > { %v2586_v53 = vpop.f32.mrf.mxu0  ;;  %1510 = vmax.xlane.f32.xlu0 %v1509_v52 }
 0x295   : > { %1283 = vst.msk [vmem:[%s3391_s30 + $0x80] sm:$0xff] %vm1266_vm1, %v1248_v51  ;;  %v1263_v55 = vadd.f32 %v2586_v53, %v3387_v46  ;;  %v3511_v60 = vsub.f32 %v1248_v51, %v1440_v40  ;;  %v1518_v2 = vsel %vm1266_vm1, %v3513_v61, -inf }
 0x296   : > { %v1257_v62 = vpop.f32.mrf.mxu0  ;;  %1513 = vmax.xlane.f32.xlu1 %v1512_v59 }
 0x297   : > { %1286 = vst.msk [vmem:[%s3391_s30 + $0x98] sm:$0xff] %vm1266_vm1, %v1263_v55  ;;  %v1258_v63 = vadd.f32 %v3387_v46, %v1257_v62  ;;  %v1515_v1 = vsel %vm1266_vm1, %v3511_v60, -inf  ;;  %v3526_v4 = vsub.f32 %v1263_v55, %v1446_v37 }
 0x298   : > { %1516 = vmax.xlane.f32.xlu0 %v1515_v1 }
 0x299   : > { %1285 = vst.msk [vmem:[%s3391_s30 + $0x90] sm:$0xff] %vm1266_vm1, %v1258_v63  ;;  %v3524_v3 = vsub.f32 %v1258_v63, %v1444_v54  ;;  %v1524_v46 = vsel %vm1266_vm1, %v3526_v4, -inf }
 0x29a   : > { %1519 = vmax.xlane.f32.xlu1 %v1518_v2 }
 0x29b   : > { %v1521_v5 = vsel %vm1266_vm1, %v3524_v3, -inf }
 0x29c   : > { %1522 = vmax.xlane.f32.xlu0 %v1521_v5 }
 0x29e   : > { %1525 = vmax.xlane.f32.xlu1 %v1524_v46 }
 0x2ff   : > { %v1472_v8 = vpop.xlane.xlu0 %1471 }
 0x300   : > { %v1528_v10 = vsub.f32 %v3396_v0, %v1472_v8 }
 0x302   : > { %v1549_v57 = vmul.f32 1.442695, %v1528_v10 }
 0x303   : > { %v1478_v11 = vpop.xlane.xlu1 %1477  ;;  %v1469_v12 = vpop.xlane.xlu0 %1468 }
 0x304   : > { %2830 = vpow2.f32 %v1549_v57  ;;  %v1530_v13 = vsub.f32 %v3408_v15, %v1478_v11  ;;  %v1527_v14 = vsub.f32 %v3403_v9, %v1469_v12 }
 0x306   : > { %v1553_v16 = vmul.f32 1.442695, %v1530_v13  ;;  %v1547_v17 = vmul.f32 1.442695, %v1527_v14 }
 0x307   : > { %v1475_v18 = vpop.xlane.xlu1 %1474 }
 0x308   : > { %2832 = vpow2.f32 %v1553_v16  ;;  %v1529_v21 = vsub.f32 %v3417_v27, %v1475_v18 }
 0x309   : > { %2834 = vpow2.f32 %v1547_v17  ;;  %v1481_v22 = vpop.xlane.xlu0 %1480 }
 0x30a   : > { %v1551_v23 = vmul.f32 1.442695, %v1529_v21  ;;  %v1531_v24 = vsub.f32 %v3427_v42, %v1481_v22 }
 0x30b   : > { %v1484_v0 = vpop.xlane.xlu1 %1483 }
 0x30c   : > { %2836 = vpow2.f32 %v1551_v23  ;;  %v1555_v25 = vmul.f32 1.442695, %v1531_v24  ;;  %v1532_v26 = vsub.f32 %v3429_v43, %v1484_v0 }
 0x30d   : > { %v1487_v28 = vpop.xlane.xlu0 %1486 }
 0x30e   : > { %v1557_v15 = vmul.f32 1.442695, %v1532_v26  ;;  %v1533_v9 = vsub.f32 %v3441_v56, %v1487_v28  ;;  %2838 = vpow2.f32 %v1555_v25 }
 0x30f   : > { %v1490_v29 = vpop.xlane.xlu1 %1489 }
 0x310   : > { %2840 = vpow2.f32 %v1557_v15  ;;  %v1559_v30 = vmul.f32 1.442695, %v1533_v9  ;;  %v1534_v27 = vsub.f32 %v3443_v58, %v1490_v29 }
 0x311   : > { %v3540_v31 = vpop.eup %2830  ;;  %v1493_v34 = vpop.xlane.xlu0 %1492 }
 0x312   : > { %v1561_v35 = vmul.f32 1.442695, %v1534_v27  ;;  %v1535_v42 = vsub.f32 %v3455_v6, %v1493_v34  ;;  %v1590_v36 = vsel %vm1266_vm1, %v3540_v31, 0.0  ;;  %2842 = vpow2.f32 %v1559_v30 }
 0x313   : > { %1591 = vadd.xlane.f32.xlu1 %v1590_v36  ;;  %v1496_v43 = vpop.xlane.xlu1 %1495 }
 0x314   : > { %2844 = vpow2.f32 %v1561_v35  ;;  %v1563_v56 = vmul.f32 1.442695, %v1535_v42  ;;  %v1536_v38 = vsub.f32 %v3457_v7, %v1496_v43 }
 0x315   : > { %v3546_v39 = vpop.eup %2832  ;;  %v1499_v40 = vpop.xlane.xlu0 %1498 }
 0x316   : > { %v3548_v58 = vpop.eup %2834  ;;  %v1565_v41 = vmul.f32 1.442695, %v1536_v38  ;;  %v1537_v44 = vsub.f32 %v3469_v19, %v1499_v40  ;;  %v1596_v6 = vsel %vm1266_vm1, %v3546_v39, 0.0  ;;  %2846 = vpow2.f32 %v1563_v56 }
 0x317   : > { %1597 = vadd.xlane.f32.xlu1 %v1596_v6  ;;  %v1502_v45 = vpop.xlane.xlu1 %1501  ;;  %v1587_v47 = vsel %vm1266_vm1, %v3548_v58, 0.0 }
 0x318   : > { %2848 = vpow2.f32 %v1565_v41  ;;  %v1567_v50 = vmul.f32 1.442695, %v1537_v44  ;;  %v1538_v7 = vsub.f32 %v3471_v20, %v1502_v45  ;;  %1588 = vadd.xlane.f32.xlu0 %v1587_v47 }
 0x319   : > { %v3556_v51 = vpop.eup %2836  ;;  %v1505_v52 = vpop.xlane.xlu0 %1504 }
 0x31a   : > { %v1569_v53 = vmul.f32 1.442695, %v1538_v7  ;;  %v1539_v19 = vsub.f32 %v3483_v32, %v1505_v52  ;;  %v1593_v54 = vsel %vm1266_vm1, %v3556_v51, 0.0  ;;  %2850 = vpow2.f32 %v1567_v50 }
 0x31b   : > { %v1508_v37 = vpop.xlane.xlu1 %1507  ;;  %v3561_v55 = vpop.eup %2838 }
 0x31c   : > { %2852 = vpow2.f32 %v1569_v53  ;;  %v1571_v59 = vmul.f32 1.442695, %v1539_v19  ;;  %v1540_v62 = vsub.f32 %v3485_v33, %v1508_v37  ;;  %1594 = vadd.xlane.f32.xlu0 %v1593_v54  ;;  %v1599_v46 = vsel %vm1266_vm1, %v3561_v55, 0.0 }
 0x31d   : > { %v3564_v20 = vpop.eup %2840  ;;  %v1511_v63 = vpop.xlane.xlu0 %1510 }
 0x31e   : > { %v1573_v1 = vmul.f32 1.442695, %v1540_v62  ;;  %v1541_v2 = vsub.f32 %v3497_v48, %v1511_v63  ;;  %v1602_v32 = vsel %vm1266_vm1, %v3564_v20, 0.0  ;;  %2854 = vpow2.f32 %v1571_v59 }
 0x31f   : > { %1603 = vadd.xlane.f32.xlu1 %v1602_v32  ;;  %v1514_v5 = vpop.xlane.xlu1 %1513  ;;  %v3571_v8 = vpop.eup %2842 }
 0x320   : > { %2856 = vpow2.f32 %v1573_v1  ;;  %v1575_v33 = vmul.f32 1.442695, %v1541_v2  ;;  %v1542_v10 = vsub.f32 %v3499_v49, %v1514_v5  ;;  %1600 = vadd.xlane.f32.xlu0 %v1599_v46  ;;  %v1605_v16 = vsel %vm1266_vm1, %v3571_v8, 0.0 }
 0x321   : > { %v3574_v57 = vpop.eup %2844  ;;  %v1517_v11 = vpop.xlane.xlu0 %1516 }
 0x322   : > { %v1577_v48 = vmul.f32 1.442695, %v1542_v10  ;;  %v1543_v12 = vsub.f32 %v3511_v60, %v1517_v11  ;;  %v1608_v13 = vsel %vm1266_vm1, %v3574_v57, 0.0  ;;  %2858 = vpow2.f32 %v1575_v33 }
 0x323   : > { %1609 = vadd.xlane.f32.xlu1 %v1608_v13  ;;  %v1520_v14 = vpop.xlane.xlu1 %1519  ;;  %v3581_v17 = vpop.eup %2846 }
 0x324   : > { %2860 = vpow2.f32 %v1577_v48  ;;  %v1579_v49 = vmul.f32 1.442695, %v1543_v12  ;;  %v1544_v18 = vsub.f32 %v3513_v61, %v1520_v14  ;;  %1606 = vadd.xlane.f32.xlu0 %v1605_v16  ;;  %v1611_v25 = vsel %vm1266_vm1, %v3581_v17, 0.0 }
 0x325   : > { %v3584_v21 = vpop.eup %2848  ;;  %v1523_v22 = vpop.xlane.xlu0 %1522 }
 0x326   : > { %v1581_v60 = vmul.f32 1.442695, %v1544_v18  ;;  %v1545_v23 = vsub.f32 %v3524_v3, %v1523_v22  ;;  %v1614_v24 = vsel %vm1266_vm1, %v3584_v21, 0.0  ;;  %2862 = vpow2.f32 %v1579_v49 }
 0x327   : > { %1615 = vadd.xlane.f32.xlu1 %v1614_v24  ;;  %v1526_v0 = vpop.xlane.xlu1 %1525  ;;  %v3591_v26 = vpop.eup %2850 }
 0x328   : > { %2864 = vpow2.f32 %v1581_v60  ;;  %v1583_v61 = vmul.f32 1.442695, %v1545_v23  ;;  %v1546_v28 = vsub.f32 %v3526_v4, %v1526_v0  ;;  %1612 = vadd.xlane.f32.xlu0 %v1611_v25  ;;  %v1617_v29 = vsel %vm1266_vm1, %v3591_v26, 0.0 }
 0x329   : > { %v3594_v15 = vpop.eup %2852 }
 0x32a   : > { %v1585_v9 = vmul.f32 1.442695, %v1546_v28  ;;  %v1620_v3 = vsel %vm1266_vm1, %v3594_v15, 0.0  ;;  %2866 = vpow2.f32 %v1583_v61 }
 0x32b   : > { %1621 = vadd.xlane.f32.xlu1 %v1620_v3  ;;  %v3600_v30 = vpop.eup %2854 }
 0x32c   : > { %2868 = vpow2.f32 %v1585_v9  ;;  %1618 = vadd.xlane.f32.xlu0 %v1617_v29  ;;  %v1623_v34 = vsel %vm1266_vm1, %v3600_v30, 0.0 }
 0x32d   : > { %v3602_v27 = vpop.eup %2856 }
 0x32e   : > { %v1626_v4 = vsel %vm1266_vm1, %v3602_v27, 0.0 }
 0x32f   : > { %1627 = vadd.xlane.f32.xlu1 %v1626_v4  ;;  %v3608_v35 = vpop.eup %2858 }
 0x330   : > { %1624 = vadd.xlane.f32.xlu0 %v1623_v34  ;;  %v1629_v43 = vsel %vm1266_vm1, %v3608_v35, 0.0 }
 0x331   : > { %v3610_v42 = vpop.eup %2860 }
 0x332   : > { %v1632_v36 = vsel %vm1266_vm1, %v3610_v42, 0.0 }
 0x333   : > { %1633 = vadd.xlane.f32.xlu1 %v1632_v36  ;;  %v3616_v56 = vpop.eup %2862 }
 0x334   : > { %1630 = vadd.xlane.f32.xlu0 %v1629_v43  ;;  %v1635_v41 = vsel %vm1266_vm1, %v3616_v56, 0.0 }
 0x335   : > { %v3618_v38 = vpop.eup %2864 }
 0x336   : > { %v1638_v40 = vsel %vm1266_vm1, %v3618_v38, 0.0 }
 0x337   : > { %1639 = vadd.xlane.f32.xlu1 %v1638_v40  ;;  %v3624_v44 = vpop.eup %2866 }
 0x338   : > { %1636 = vadd.xlane.f32.xlu0 %v1635_v41  ;;  %v1641_v47 = vsel %vm1266_vm1, %v3624_v44, 0.0 }
 0x339   : > { %v3626_v6 = vpop.eup %2868 }
 0x33a   : > { %v1644_v45 = vsel %vm1266_vm1, %v3626_v6, 0.0 }
 0x33b   : > { %1645 = vadd.xlane.f32.xlu1 %v1644_v45 }
 0x33c   : > { %1642 = vadd.xlane.f32.xlu0 %v1641_v47 }
 0x39c   : > { %v1592_v50 = vpop.xlane.xlu1 %1591 }
 0x39d   : > { %2870 = vrcp.f32 %v1592_v50 }
 0x3a0   : > { %v1598_v7 = vpop.xlane.xlu1 %1597 }
 0x3a1   : > { %2872 = vrcp.f32 %v1598_v7  ;;  %v1589_v52 = vpop.xlane.xlu0 %1588 }
 0x3a2   : > { %2874 = vrcp.f32 %v1589_v52 }
 0x3a5   : > { %v1595_v53 = vpop.xlane.xlu0 %1594 }
 0x3a6   : > { %2876 = vrcp.f32 %v1595_v53 }
 0x3a8   : > { %v1604_v19 = vpop.xlane.xlu1 %1603 }
 0x3a9   : > { %2878 = vrcp.f32 %v1604_v19  ;;  %v1601_v54 = vpop.xlane.xlu0 %1600 }
 0x3aa   : > { %v2871_v37 = vpop.eup %2870  ;;  %2880 = vrcp.f32 %v1601_v54 }
 0x3ab   : > { %v1650_v59 = vmul.f32 %v2871_v37, %v3540_v31 }
 0x3ac   : > { %v1610_v62 = vpop.xlane.xlu1 %1609 }
 0x3ad   : > { %1688 = vst.msk [vmem:[%s3634_s23 + $0x8] sm:$0xff] %vm1266_vm1, %v1650_v59  ;;  %2882 = vrcp.f32 %v1610_v62  ;;  %v1607_v63 = vpop.xlane.xlu0 %1606 }
 0x3ae   : > { %v2873_v1 = vpop.eup %2872  ;;  %2884 = vrcp.f32 %v1607_v63 }
 0x3af   : > { %v2875_v2 = vpop.eup %2874  ;;  %v1654_v32 = vmul.f32 %v2873_v1, %v3546_v39 }
 0x3b0   : > { %v1648_v5 = vmul.f32 %v2875_v2, %v3548_v58  ;;  %v1616_v46 = vpop.xlane.xlu1 %1615 }
 0x3b1   : > { %1690 = vst.msk [vmem:[%s3634_s23 + $0x18] sm:$0xff] %vm1266_vm1, %v1654_v32  ;;  %2886 = vrcp.f32 %v1616_v46  ;;  %v1613_v31 = vpop.xlane.xlu0 %1612 }
 0x3b2   : > { %1687 = vst.msk [vmem:[%s3634_s23] sm:$0xff] %vm1266_vm1, %v1648_v5  ;;  %2888 = vrcp.f32 %v1613_v31 }
 0x3b3   : > { %v2877_v33 = vpop.eup %2876 }
 0x3b4   : > { %v1652_v10 = vmul.f32 %v2877_v33, %v3556_v51  ;;  %v1622_v11 = vpop.xlane.xlu1 %1621 }
 0x3b5   : > { %2890 = vrcp.f32 %v1622_v11  ;;  %v1619_v48 = vpop.xlane.xlu0 %1618 }
 0x3b6   : > { %v2879_v12 = vpop.eup %2878  ;;  %1689 = vst.msk [vmem:[%s3634_s23 + $0x10] sm:$0xff] %vm1266_vm1, %v1652_v10  ;;  %2892 = vrcp.f32 %v1619_v48 }
 0x3b7   : > { %v2881_v39 = vpop.eup %2880  ;;  %v1658_v58 = vmul.f32 %v2879_v12, %v3564_v20 }
 0x3b8   : > { %v1656_v13 = vmul.f32 %v2881_v39, %v3561_v55  ;;  %v1628_v14 = vpop.xlane.xlu1 %1627 }
 0x3b9   : > { %1692 = vst.msk [vmem:[%s3634_s23 + $0x28] sm:$0xff] %vm1266_vm1, %v1658_v58  ;;  %2894 = vrcp.f32 %v1628_v14  ;;  %v1625_v16 = vpop.xlane.xlu0 %1624 }
 0x3ba   : > { %v2883_v51 = vpop.eup %2882  ;;  %1691 = vst.msk [vmem:[%s3634_s23 + $0x20] sm:$0xff] %vm1266_vm1, %v1656_v13  ;;  %2896 = vrcp.f32 %v1625_v16 }
 0x3bb   : > { %v2885_v49 = vpop.eup %2884  ;;  %v1662_v18 = vmul.f32 %v2883_v51, %v3574_v57 }
 0x3bc   : > { %v1660_v22 = vmul.f32 %v2885_v49, %v3571_v8  ;;  %v1634_v20 = vpop.xlane.xlu1 %1633 }
 0x3bd   : > { %1694 = vst.msk [vmem:[%s3634_s23 + $0x38] sm:$0xff] %vm1266_vm1, %v1662_v18  ;;  %2898 = vrcp.f32 %v1634_v20  ;;  %v1631_v55 = vpop.xlane.xlu0 %1630 }
 0x3be   : > { %v2887_v60 = vpop.eup %2886  ;;  %1693 = vst.msk [vmem:[%s3634_s23 + $0x30] sm:$0xff] %vm1266_vm1, %v1660_v22  ;;  %2900 = vrcp.f32 %v1631_v55 }
 0x3bf   : > { %v2889_v23 = vpop.eup %2888  ;;  %v1666_v24 = vmul.f32 %v2887_v60, %v3584_v21 }
 0x3c0   : > { %v1664_v0 = vmul.f32 %v2889_v23, %v3581_v17  ;;  %v1640_v57 = vpop.xlane.xlu1 %1639 }
 0x3c1   : > { %1696 = vst.msk [vmem:[%s3634_s23 + $0x48] sm:$0xff] %vm1266_vm1, %v1666_v24  ;;  %2902 = vrcp.f32 %v1640_v57  ;;  %v1637_v8 = vpop.xlane.xlu0 %1636 }
 0x3c2   : > { %v2891_v25 = vpop.eup %2890  ;;  %1695 = vst.msk [vmem:[%s3634_s23 + $0x40] sm:$0xff] %vm1266_vm1, %v1664_v0  ;;  %2904 = vrcp.f32 %v1637_v8 }
 0x3c3   : > { %v2893_v61 = vpop.eup %2892  ;;  %v1670_v28 = vmul.f32 %v2891_v25, %v3594_v15 }
 0x3c4   : > { %v1668_v9 = vmul.f32 %v2893_v61, %v3591_v26  ;;  %v1646_v21 = vpop.xlane.xlu1 %1645 }
 0x3c5   : > { %1698 = vst.msk [vmem:[%s3634_s23 + $0x58] sm:$0xff] %vm1266_vm1, %v1670_v28  ;;  %2906 = vrcp.f32 %v1646_v21  ;;  %v1643_v17 = vpop.xlane.xlu0 %1642 }
 0x3c6   : > { %v2895_v3 = vpop.eup %2894  ;;  %1697 = vst.msk [vmem:[%s3634_s23 + $0x50] sm:$0xff] %vm1266_vm1, %v1668_v9  ;;  %2908 = vrcp.f32 %v1643_v17 }
 0x3c7   : > { %v2897_v29 = vpop.eup %2896  ;;  %v1674_v4 = vmul.f32 %v2895_v3, %v3602_v27 }
 0x3c8   : > { %v1672_v15 = vmul.f32 %v2897_v29, %v3600_v30 }
 0x3c9   : > { %1700 = vst.msk [vmem:[%s3634_s23 + $0x68] sm:$0xff] %vm1266_vm1, %v1674_v4 }
 0x3ca   : > { %v2899_v26 = vpop.eup %2898  ;;  %1699 = vst.msk [vmem:[%s3634_s23 + $0x60] sm:$0xff] %vm1266_vm1, %v1672_v15 }
 0x3cb   : > { %v2901_v34 = vpop.eup %2900  ;;  %v1678_v36 = vmul.f32 %v2899_v26, %v3610_v42 }
 0x3cc   : > { %v1676_v43 = vmul.f32 %v2901_v34, %v3608_v35 }
 0x3cd   : > { %1702 = vst.msk [vmem:[%s3634_s23 + $0x78] sm:$0xff] %vm1266_vm1, %v1678_v36 }
 0x3ce   : > { %v2903_v40 = vpop.eup %2902  ;;  %1701 = vst.msk [vmem:[%s3634_s23 + $0x70] sm:$0xff] %vm1266_vm1, %v1676_v43 }
 0x3cf   : > { %v2905_v27 = vpop.eup %2904  ;;  %v1682_v30 = vmul.f32 %v2903_v40, %v3618_v38 }
 0x3d0   : > { %v1680_v41 = vmul.f32 %v2905_v27, %v3616_v56 }
 0x3d1   : > { %1704 = vst.msk [vmem:[%s3634_s23 + $0x88] sm:$0xff] %vm1266_vm1, %v1682_v30 }
 0x3d2   : > { %v2907_v45 = vpop.eup %2906  ;;  %1703 = vst.msk [vmem:[%s3634_s23 + $0x80] sm:$0xff] %vm1266_vm1, %v1680_v41  ;;  %1717 = sbr.rel (!%p3145_p4) target bundleno = 1039 (0x40f), region = 56 }
 0x3d3   : > { %v2909_v47 = vpop.eup %2908  ;;  %v1686_v42 = vmul.f32 %v2907_v45, %v3626_v6 }
 0x3d4   : > { %v1684_v35 = vmul.f32 %v2909_v47, %v3624_v44 }
 0x3d5   : > { %1706 = vst.msk [vmem:[%s3634_s23 + $0x98] sm:$0xff] %vm1266_vm1, %v1686_v42 }
 0x3d6   : > { %1705 = vst.msk [vmem:[%s3634_s23 + $0x90] sm:$0xff] %vm1266_vm1, %v1684_v35 }
 0x3d7   : > { %s3918_s24 = smov (!%p1720_p8, %s1719_s24), 20 }
 0x3d8   : > { %s2353_s14 = sshll.u32 %s3918_s24, 7 }
 0x3d9   : > { %p2356_p9 = scmp.eq.s32.totalorder %s2353_s14, 0 }
 0x3da   : > { %2910 = sdivrem.u32 (!%p2356_p9), %s3918_s24, 20 }
 0x3db   : > { %1728 = sbr.rel (%p2356_p9) target bundleno = 1039 (0x40f), region = 60 }
 0x3e3   : > { %s3708_s15 = spop.drf %2910 }
 0x3e4   : > { %p2357_p10 = scmp.le.s32.totalorder %s3708_s15, 0 }
 0x3e5   : > { %s3908_s19 = smov (!%p2357_p10), %s3702_s11  ;;  %s3909_s20 = smov (!%p2357_p10), %s3634_s23 }
 0x3e6   : > { %2197 = sbr.rel (%p2357_p10) target bundleno = 1014 (0x3f6), region = 211  ;;  %s3717_s27 = smov (!%p2357_p10), 0  }
 0x3e7   : > { %s3719_s28 = smov (!%p2357_p10), 0  }
 0x3eb LB: >> { %v1831_v56 = vld [vmem:[%s3012_s20] sm:$0xff]  ;;  %v1833_v38 = vld [vmem:[%s3012_s20 + $0x8] sm:$0xff]  ;;  %v1835_v44 = vld [vmem:[%s3012_s20 + $0x10] sm:$0xff]  ;;  %s1871_s21 = sadd.s32 1, %s3016_s27  ;;  %s1825_s28 = sadd.s32 1, %s3020_s28   ;;  %s3020_s28 = sphi %s3719_s28, %s1825_s28   ;;  %s3016_s27 = sphi %s3717_s27, %s3910_s27   ;;  %s3012_s20 = sphi %s3909_s20, %s1876_s20   ;;  %s3008_s19 = sphi %s3908_s19, %s1877_s19  }
 0x3ec   : >> { %1832 = vst [vmem:[%s3008_s19] sm:$0xff] %v1831_v56  ;;  %1834 = vst [vmem:[%s3008_s19 + $0x8] sm:$0xff] %v1833_v38  ;;  %v1837_v6 = vld [vmem:[%s3012_s20 + $0x18] sm:$0xff]  ;;  %v1839_v50 = vld [vmem:[%s3012_s20 + $0x20] sm:$0xff]  ;;  %p1872_p11 = scmp.ge.s32.totalorder %s1871_s21, %s3708_s15  ;;  %p1824_p12 = scmp.ge.s32.totalorder %s1825_s28, %s3708_s15 }
 0x3ed   : >> { %1836 = vst [vmem:[%s3008_s19 + $0x10] sm:$0xff] %v1835_v44  ;;  %v1841_v7 = vld [vmem:[%s3012_s20 + $0x28] sm:$0xff]  ;;  %1838 = vst [vmem:[%s3008_s19 + $0x18] sm:$0xff] %v1837_v6  ;;  %v1843_v52 = vld [vmem:[%s3012_s20 + $0x30] sm:$0xff] }
 0x3ee   : >> { %1840 = vst [vmem:[%s3008_s19 + $0x20] sm:$0xff] %v1839_v50  ;;  %1842 = vst [vmem:[%s3008_s19 + $0x28] sm:$0xff] %v1841_v7  ;;  %v1845_v53 = vld [vmem:[%s3012_s20 + $0x38] sm:$0xff]  ;;  %v1847_v19 = vld [vmem:[%s3012_s20 + $0x40] sm:$0xff]  ;;  %s3920_s21 = smov (%p1872_p11, %s1871_s21), 0 }
 0x3ef   : >> { %1844 = vst [vmem:[%s3008_s19 + $0x30] sm:$0xff] %v1843_v52  ;;  %1846 = vst [vmem:[%s3008_s19 + $0x38] sm:$0xff] %v1845_v53  ;;  %v1849_v54 = vld [vmem:[%s3012_s20 + $0x48] sm:$0xff]  ;;  %v1851_v37 = vld [vmem:[%s3012_s20 + $0x50] sm:$0xff]  ;;  %s1874_s18 = smul.u32 160, %s3920_s21  ;;  %s3910_s27 = smov %s3920_s21 }
 0x3f0   : >> { %1848 = vst [vmem:[%s3008_s19 + $0x40] sm:$0xff] %v1847_v19  ;;  %v1853_v59 = vld [vmem:[%s3012_s20 + $0x58] sm:$0xff]  ;;  %1850 = vst [vmem:[%s3008_s19 + $0x48] sm:$0xff] %v1849_v54  ;;  %v1855_v62 = vld [vmem:[%s3012_s20 + $0x60] sm:$0xff] }
 0x3f1   : >> { %1852 = vst [vmem:[%s3008_s19 + $0x50] sm:$0xff] %v1851_v37  ;;  %1854 = vst [vmem:[%s3008_s19 + $0x58] sm:$0xff] %v1853_v59  ;;  %v1857_v63 = vld [vmem:[%s3012_s20 + $0x68] sm:$0xff]  ;;  %v1859_v1 = vld [vmem:[%s3012_s20 + $0x70] sm:$0xff]  ;;  %1827 = sbr.rel (!%p1824_p12) target bundleno = 1003 (0x3eb), region = 217 }
 0x3f2   : >> { %1856 = vst [vmem:[%s3008_s19 + $0x60] sm:$0xff] %v1855_v62  ;;  %1858 = vst [vmem:[%s3008_s19 + $0x68] sm:$0xff] %v1857_v63  ;;  %v1861_v2 = vld [vmem:[%s3012_s20 + $0x78] sm:$0xff]  ;;  %v1863_v32 = vld [vmem:[%s3012_s20 + $0x80] sm:$0xff] }
 0x3f3   : >> { %1860 = vst [vmem:[%s3008_s19 + $0x70] sm:$0xff] %v1859_v1  ;;  %v1865_v5 = vld [vmem:[%s3012_s20 + $0x88] sm:$0xff]  ;;  %1862 = vst [vmem:[%s3008_s19 + $0x78] sm:$0xff] %v1861_v2  ;;  %v1867_v46 = vld [vmem:[%s3012_s20 + $0x90] sm:$0xff] }
 0x3f4   : >> { %1864 = vst [vmem:[%s3008_s19 + $0x80] sm:$0xff] %v1863_v32  ;;  %1866 = vst [vmem:[%s3008_s19 + $0x88] sm:$0xff] %v1865_v5  ;;  %v1869_v31 = vld [vmem:[%s3012_s20 + $0x98] sm:$0xff]  ;;  %s1876_s20 = scalar_lea.vmem %s3634_s23, %s1874_s18 [#allocation2]  }
 0x3f5   : >> { %1868 = vst [vmem:[%s3008_s19 + $0x90] sm:$0xff] %v1867_v46  ;;  %1870 = vst [vmem:[%s3008_s19 + $0x98] sm:$0xff] %v1869_v31  ;;  %s1877_s19 = scalar_lea.vmem %s3702_s11, %s1874_s18  }
 0x3f6 PF: > { %2912 = sdivrem.u32 %s3918_s24, 20 }
 0x3f7   : > { %s2358_s25 = smul.u32 160, %s3708_s15 }
 0x3f9   : > { %s1882_s26 = scalar_lea.vmem %s3634_s23, %s2358_s25 [#allocation2]   ;;  %s1884_s29 = scalar_lea.vmem %s3702_s11, %s2358_s25  }
 0x3ff   : > { %s2913_s14 = spop.drf %2912 }
 0x400   : > { %p2360_p13 = scmp.le.s32.totalorder %s2913_s14, 0 }
 0x401   : > { %s3022_s18 = smov (!%p2360_p13), %s1884_s29   ;;  %s3026_s0 = smov (!%p2360_p13), %s1882_s26  }
 0x402   : > { %2211 = sbr.rel (%p2360_p13) target bundleno = 1039 (0x40f), region = 222  ;;  %s3030_s1 = smov (!%p2360_p13), 0  }
 0x403   : > { %s3034_s2 = smov (!%p2360_p13), 0  }
 0x407 LB: >> { %v1894_v33 = vld [vmem:[%s3028_s0] sm:$0xff]  ;;  %s1896_s19 = sadd.s32 1, %s3032_s1  ;;  %s1888_s2 = sadd.s32 1, %s3036_s2   ;;  %s3036_s2 = sphi %s3034_s2, %s1888_s2   ;;  %s3032_s1 = sphi %s3030_s1, %s3031_s1   ;;  %s3028_s0 = sphi %s3026_s0, %s1901_s0   ;;  %s3024_s18 = sphi %s3022_s18, %s1902_s18  }
 0x408   : >> { %1895 = vst [vmem:[%s3024_s18] sm:$0xff] %v1894_v33  ;;  %p1897_p0 = scmp.ge.s32.totalorder %s1896_s19, %s2913_s14  ;;  %p1887_p1 = scmp.ge.s32.totalorder %s1888_s2, %s2913_s14 }
 0x40a   : >> { %s3922_s19 = smov (%p1897_p0, %s1896_s19), 0  ;;  %1890 = sbr.rel (!%p1887_p1) target bundleno = 1031 (0x407), region = 228 }
 0x40b   : >> { %s2361_s23 = sshll.u32 %s3922_s19, 3  ;;  %s3031_s1 = smov %s3922_s19  }
 0x40c   : >> { %s1901_s0 = scalar_lea.vmem %s1882_s26, %s2361_s23 [#allocation2]   ;;  %s1902_s18 = scalar_lea.vmem %s1884_s29, %s2361_s23  }
 0x40f PF: > { %1908 = sbr.rel (!%p3145_p4) target bundleno = 1100 (0x44c), region = 108  ;;  %s1910_s1 = ssub.s32 (%p3145_p4), 38, %s3156_s22 }
 0x410   : > { %s2376_s24 = smul.u32 (%p3145_p4), 160, %s3133_s12  ;;  %p1911_p2 = scmp.lt.s32.totalorder (%p3145_p4), %s1910_s1, 20 }
 0x412   : > { %s3795_s20 = scalar_lea.vmem (%p3145_p4), %s3900_s9, %s2376_s24  }
 0x414   : > { %s3924_s1 = smov (!%p1911_p2, %s1910_s1), 20 }
 0x415   : > { %s2363_s0 = sshll.u32 %s3924_s1, 7 }
 0x416   : > { %p2366_p3 = scmp.eq.s32.totalorder %s2363_s0, 0 }
 0x417   : > { %2914 = sdivrem.u32 (!%p2366_p3), %s3924_s1, 20 }
 0x418   : > { %1919 = sbr.rel (%p2366_p3) target bundleno = 1100 (0x44c), region = 112 }
 0x420   : > { %s3801_s2 = spop.drf %2914 }
 0x421   : > { %p2367_p4 = scmp.le.s32.totalorder %s3801_s2, 0 }
 0x422   : > { %s3911_s12 = smov (!%p2367_p4), %s3795_s20  ;;  %s3912_s17 = smov (!%p2367_p4), %s3391_s30 }
 0x423   : > { %2225 = sbr.rel (%p2367_p4) target bundleno = 1075 (0x433), region = 233  ;;  %s3810_s22 = smov (!%p2367_p4), 0  }
 0x424   : > { %s3812_s27 = smov (!%p2367_p4), 0  }
 0x428 LB: >> { %v2022_v10 = vld [vmem:[%s3044_s17] sm:$0xff]  ;;  %v2024_v11 = vld [vmem:[%s3044_s17 + $0x8] sm:$0xff]  ;;  %v2026_v48 = vld [vmem:[%s3044_s17 + $0x10] sm:$0xff]  ;;  %s2062_s28 = sadd.s32 1, %s3048_s22  ;;  %s2016_s27 = sadd.s32 1, %s3052_s27   ;;  %s3052_s27 = sphi %s3812_s27, %s2016_s27   ;;  %s3048_s22 = sphi %s3810_s22, %s3913_s22   ;;  %s3044_s17 = sphi %s3912_s17, %s2067_s17   ;;  %s3040_s12 = sphi %s3911_s12, %s2068_s12  }
 0x429   : >> { %2023 = vst [vmem:[%s3040_s12] sm:$0xff] %v2022_v10  ;;  %2025 = vst [vmem:[%s3040_s12 + $0x8] sm:$0xff] %v2024_v11  ;;  %v2028_v12 = vld [vmem:[%s3044_s17 + $0x18] sm:$0xff]  ;;  %v2030_v39 = vld [vmem:[%s3044_s17 + $0x20] sm:$0xff]  ;;  %p2063_p5 = scmp.ge.s32.totalorder %s2062_s28, %s3801_s2  ;;  %p2015_p6 = scmp.ge.s32.totalorder %s2016_s27, %s3801_s2 }
 0x42a   : >> { %2027 = vst [vmem:[%s3040_s12 + $0x10] sm:$0xff] %v2026_v48  ;;  %v2032_v58 = vld [vmem:[%s3044_s17 + $0x28] sm:$0xff]  ;;  %2029 = vst [vmem:[%s3040_s12 + $0x18] sm:$0xff] %v2028_v12  ;;  %v2034_v13 = vld [vmem:[%s3044_s17 + $0x30] sm:$0xff] }
 0x42b   : >> { %2031 = vst [vmem:[%s3040_s12 + $0x20] sm:$0xff] %v2030_v39  ;;  %2033 = vst [vmem:[%s3040_s12 + $0x28] sm:$0xff] %v2032_v58  ;;  %v2036_v14 = vld [vmem:[%s3044_s17 + $0x38] sm:$0xff]  ;;  %v2038_v16 = vld [vmem:[%s3044_s17 + $0x40] sm:$0xff]  ;;  %s3926_s28 = smov (%p2063_p5, %s2062_s28), 0 }
 0x42c   : >> { %2035 = vst [vmem:[%s3040_s12 + $0x30] sm:$0xff] %v2034_v13  ;;  %2037 = vst [vmem:[%s3040_s12 + $0x38] sm:$0xff] %v2036_v14  ;;  %v2040_v51 = vld [vmem:[%s3044_s17 + $0x48] sm:$0xff]  ;;  %v2042_v49 = vld [vmem:[%s3044_s17 + $0x50] sm:$0xff]  ;;  %s2065_s21 = smul.u32 160, %s3926_s28  ;;  %s3913_s22 = smov %s3926_s28 }
 0x42d   : >> { %2039 = vst [vmem:[%s3040_s12 + $0x40] sm:$0xff] %v2038_v16  ;;  %v2044_v18 = vld [vmem:[%s3044_s17 + $0x58] sm:$0xff]  ;;  %2041 = vst [vmem:[%s3040_s12 + $0x48] sm:$0xff] %v2040_v51  ;;  %v2046_v22 = vld [vmem:[%s3044_s17 + $0x60] sm:$0xff] }
 0x42e   : >> { %2043 = vst [vmem:[%s3040_s12 + $0x50] sm:$0xff] %v2042_v49  ;;  %2045 = vst [vmem:[%s3040_s12 + $0x58] sm:$0xff] %v2044_v18  ;;  %v2048_v20 = vld [vmem:[%s3044_s17 + $0x68] sm:$0xff]  ;;  %v2050_v55 = vld [vmem:[%s3044_s17 + $0x70] sm:$0xff]  ;;  %2018 = sbr.rel (!%p2015_p6) target bundleno = 1064 (0x428), region = 239 }
 0x42f   : >> { %2047 = vst [vmem:[%s3040_s12 + $0x60] sm:$0xff] %v2046_v22  ;;  %2049 = vst [vmem:[%s3040_s12 + $0x68] sm:$0xff] %v2048_v20  ;;  %v2052_v60 = vld [vmem:[%s3044_s17 + $0x78] sm:$0xff]  ;;  %v2054_v23 = vld [vmem:[%s3044_s17 + $0x80] sm:$0xff] }
 0x430   : >> { %2051 = vst [vmem:[%s3040_s12 + $0x70] sm:$0xff] %v2050_v55  ;;  %v2056_v24 = vld [vmem:[%s3044_s17 + $0x88] sm:$0xff]  ;;  %2053 = vst [vmem:[%s3040_s12 + $0x78] sm:$0xff] %v2052_v60  ;;  %v2058_v0 = vld [vmem:[%s3044_s17 + $0x90] sm:$0xff] }
 0x431   : >> { %2055 = vst [vmem:[%s3040_s12 + $0x80] sm:$0xff] %v2054_v23  ;;  %2057 = vst [vmem:[%s3040_s12 + $0x88] sm:$0xff] %v2056_v24  ;;  %v2060_v57 = vld [vmem:[%s3044_s17 + $0x98] sm:$0xff]  ;;  %s2067_s17 = scalar_lea.vmem %s3391_s30, %s2065_s21 [#allocation3]  }
 0x432   : >> { %2059 = vst [vmem:[%s3040_s12 + $0x90] sm:$0xff] %v2058_v0  ;;  %2061 = vst [vmem:[%s3040_s12 + $0x98] sm:$0xff] %v2060_v57  ;;  %s2068_s12 = scalar_lea.vmem %s3795_s20, %s2065_s21  }
 0x433 PF: > { %2916 = sdivrem.u32 %s3924_s1, 20 }
 0x434   : > { %s2368_s25 = smul.u32 160, %s3801_s2 }
 0x436   : > { %s2073_s26 = scalar_lea.vmem %s3391_s30, %s2368_s25 [#allocation3]   ;;  %s2075_s29 = scalar_lea.vmem %s3795_s20, %s2368_s25  }
 0x43c   : > { %s2917_s14 = spop.drf %2916 }
 0x43d   : > { %p2370_p7 = scmp.le.s32.totalorder %s2917_s14, 0 }
 0x43e   : > { %s3054_s18 = smov (!%p2370_p7), %s2075_s29   ;;  %s3058_s19 = smov (!%p2370_p7), %s2073_s26  }
 0x43f   : > { %2239 = sbr.rel (%p2370_p7) target bundleno = 1100 (0x44c), region = 244  ;;  %s3062_s23 = smov (!%p2370_p7), 0  }
 0x440   : > { %s3066_s24 = smov (!%p2370_p7), 0  }
 0x444 LB: >> { %v2085_v8 = vld [vmem:[%s3060_s19] sm:$0xff]  ;;  %s2087_s11 = sadd.s32 1, %s3064_s23  ;;  %s2079_s24 = sadd.s32 1, %s3068_s24   ;;  %s3068_s24 = sphi %s3066_s24, %s2079_s24   ;;  %s3064_s23 = sphi %s3062_s23, %s3063_s23   ;;  %s3060_s19 = sphi %s3058_s19, %s2092_s19   ;;  %s3056_s18 = sphi %s3054_s18, %s2093_s18  }
 0x445   : >> { %2086 = vst [vmem:[%s3056_s18] sm:$0xff] %v2085_v8  ;;  %p2088_p8 = scmp.ge.s32.totalorder %s2087_s11, %s2917_s14  ;;  %p2078_p9 = scmp.ge.s32.totalorder %s2079_s24, %s2917_s14 }
 0x447   : >> { %s3928_s11 = smov (%p2088_p8, %s2087_s11), 0  ;;  %2081 = sbr.rel (!%p2078_p9) target bundleno = 1092 (0x444), region = 250 }
 0x448   : >> { %s2371_s30 = sshll.u32 %s3928_s11, 3  ;;  %s3063_s23 = smov %s3928_s11  }
 0x449   : >> { %s2092_s19 = scalar_lea.vmem %s2073_s26, %s2371_s30 [#allocation3]   ;;  %s2093_s18 = scalar_lea.vmem %s2075_s29, %s2371_s30  }
 0x44c PF: > { %p17_p10 = scmp.ge.s32.totalorder %s3135_s13, 4   ;;  %s3914_s30 = smov %s3000_s10 }
 0x44d   : > { %s3915_s10 = smov %s3143_s16  ;;  %s3916_s11 = smov %s3135_s13 }
 0x44e   :  { %19 = sbr.rel (!%p17_p10) target bundleno = 6 (0x6), region = 261 }

</bundles_post_ra>
